<compile_context>
chip_gen: v6e
topology: v6e:2x2x1
jax: 0.10.0
libtpu: 0.0.40
codegen_flags: <defaults>
</compile_context>

<pallas_src>
import jax
import jax.numpy as jnp
from jax.experimental import pallas as pl
from jax.experimental.pallas import tpu as pltpu

EPS = 1e-5


def bn_relu_conv1x1_kernel(x_ref, gamma_ref, beta_ref, w_ref, o_ref):
    # x_ref:     [C, M]   channel-major activation slab (resident across grid)
    # gamma_ref: [C, 1]
    # beta_ref:  [C, 1]
    # w_ref:     [TO, C]  output-channel weight tile for this grid step
    # o_ref:     [TO, M]  output tile
    x = x_ref[...]
    inv_m = 1.0 / x.shape[-1]

    # Single-pass batch statistics per channel (biased variance, training-mode BN).
    mean = jnp.sum(x, axis=-1, keepdims=True) * inv_m            # [C, 1]
    ex2 = jnp.sum(x * x, axis=-1, keepdims=True) * inv_m         # [C, 1]
    var = jnp.maximum(ex2 - mean * mean, 0.0)                    # [C, 1]

    # Fold BN into a per-channel affine, then ReLU: 2 VPU ops/elem instead of 4.
    scale = gamma_ref[...] * jax.lax.rsqrt(var + EPS)            # [C, 1]
    shift = beta_ref[...] - mean * scale                         # [C, 1]
    y = jnp.maximum(x * scale + shift, 0.0)                      # [C, M]

    # 1x1 conv (no bias) for this output-channel tile on the MXU.
    # Kept in f32 to stay within the 1e-3 reference tolerance (bf16 inputs were
    # considered but the ~sqrt(K)*2^-9 accumulation error exceeds it here).
    o_ref[...] = jnp.dot(w_ref[...], y, preferred_element_type=jnp.float32)


def bn_relu_conv1x1(x_nchw, gamma, beta, w_oc, *, to_tile=256):
    """x_nchw: [N, C, H, W] f32; gamma/beta: [C]; w_oc: [O, C] (from [O, C, 1, 1])."""
    N, C, H, W = x_nchw.shape
    O = w_oc.shape[0]
    M = N * H * W
    assert O % to_tile == 0, (O, to_tile)

    # Channel-major slab.  For N == 1 this transpose is degenerate (bitcast),
    # so no HBM transpose is actually paid.
    x_cm = jnp.transpose(x_nchw, (1, 0, 2, 3)).reshape(C, M)
    gamma2 = gamma.reshape(C, 1)
    beta2 = beta.reshape(C, 1)

    out_cm = pl.pallas_call(
        bn_relu_conv1x1_kernel,
        out_shape=jax.ShapeDtypeStruct((O, M), jnp.float32),
        grid=(O // to_tile,),
        in_specs=[
            pl.BlockSpec((C, M), lambda j: (0, 0)),        # x: resident
            pl.BlockSpec((C, 1), lambda j: (0, 0)),        # gamma
            pl.BlockSpec((C, 1), lambda j: (0, 0)),        # beta
            pl.BlockSpec((to_tile, C), lambda j: (j, 0)),  # weight tile (pipelined)
        ],
        out_specs=pl.BlockSpec((to_tile, M), lambda j: (j, 0)),
        compiler_params=pltpu.CompilerParams(
            dimension_semantics=("parallel",),
        ),
    )(x_cm, gamma2, beta2, w_oc)

    # [O, M] -> [N, O, H, W]; degenerate (free) transpose for N == 1.
    return jnp.transpose(out_cm.reshape(O, N, H, W), (1, 0, 2, 3))


def reference(x_nchw, gamma, beta, w_oc):
    mean = jnp.mean(x_nchw, axis=(0, 2, 3), keepdims=True)
    var = jnp.mean((x_nchw - mean) ** 2, axis=(0, 2, 3), keepdims=True)
    y = (x_nchw - mean) * jax.lax.rsqrt(var + EPS)
    y = y * gamma.reshape(1, -1, 1, 1) + beta.reshape(1, -1, 1, 1)
    y = jnp.maximum(y, 0.0)
    return jnp.einsum("oc,nchw->nohw", w_oc, y)


if __name__ == "__main__":
    key = jax.random.PRNGKey(0)
    k_x, k_g, k_b, k_w = jax.random.split(key, 4)

    # Shapes from the PyTorch module: BatchNorm2d(256) -> ReLU -> Conv2d(256, 1024, 1).
    N, C, H, W, O = 1, 256, 14, 14, 1024
    x = jax.random.normal(k_x, (N, C, H, W), dtype=jnp.float32)

    # Deterministic synthetic parameters (shapes match the module's layers).
    gamma = 1.0 + 0.1 * jax.random.normal(k_g, (C,), dtype=jnp.float32)
    beta = 0.1 * jax.random.normal(k_b, (C,), dtype=jnp.float32)
    bound = 1.0 / (C ** 0.5)
    w = jax.random.uniform(k_w, (O, C), minval=-bound, maxval=bound,
                           dtype=jnp.float32)

    out = jax.block_until_ready(bn_relu_conv1x1(x, gamma, beta, w))
    assert out.shape == (N, O, H, W), out.shape

    ref = jax.block_until_ready(reference(x, gamma, beta, w))
    assert jnp.allclose(out, ref, atol=1e-3, rtol=1e-3), float(
        jnp.max(jnp.abs(out - ref)))

    print("KERNEL_OK")
</pallas_src>

<mosaic_0001>
module attributes {stable_mosaic.version = 11 : i64} {
  func.func @bn_relu_conv1x1_kernel(%arg0: i32, %arg1: memref<256x196xf32, #tpu.memory_space<vmem>>, %arg2: memref<256x1xf32, #tpu.memory_space<vmem>>, %arg3: memref<256x1xf32, #tpu.memory_space<vmem>>, %arg4: memref<256x256xf32, #tpu.memory_space<vmem>>, %arg5: memref<256x196xf32, #tpu.memory_space<vmem>>) attributes {dimension_semantics = [#tpu.dimension_semantics<parallel>], iteration_bounds = array<i64: 4>, scalar_prefetch = 0 : i64, scratch_operands = 0 : i64, tpu.core_type = #tpu.core_type<tc>, window_params = [{pipeline_mode = #tpu.pipeline_mode<synchronous>, transform_indices = @transform_0, window_bounds = array<i64: 256, 196>}, {pipeline_mode = #tpu.pipeline_mode<synchronous>, transform_indices = @transform_1, window_bounds = array<i64: 256, 1>}, {pipeline_mode = #tpu.pipeline_mode<synchronous>, transform_indices = @transform_2, window_bounds = array<i64: 256, 1>}, {transform_indices = @transform_3, window_bounds = array<i64: 256, 256>}, {transform_indices = @transform_4, window_bounds = array<i64: 256, 196>}]} {
    %c0 = arith.constant 0 : index
    %c0_0 = arith.constant 0 : index
    %0 = vector.load %arg1[%c0, %c0_0] : memref<256x196xf32, #tpu.memory_space<vmem>>, vector<256x196xf32>
    %cst = arith.constant dense<0.000000e+00> : vector<256xf32>
    %1 = vector.multi_reduction <add>, %0, %cst [1] : vector<256x196xf32> to vector<256xf32>
    %2 = vector.shape_cast %1 : vector<256xf32> to vector<256x1xf32>
    %cst_1 = arith.constant 0.00510204071 : f32
    %3 = vector.broadcast %cst_1 : f32 to vector<256x1xf32>
    %4 = arith.mulf %2, %3 : vector<256x1xf32>
    %5 = arith.mulf %0, %0 : vector<256x196xf32>
    %cst_2 = arith.constant dense<0.000000e+00> : vector<256xf32>
    %6 = vector.multi_reduction <add>, %5, %cst_2 [1] : vector<256x196xf32> to vector<256xf32>
    %7 = vector.shape_cast %6 : vector<256xf32> to vector<256x1xf32>
    %cst_3 = arith.constant 0.00510204071 : f32
    %8 = vector.broadcast %cst_3 : f32 to vector<256x1xf32>
    %9 = arith.mulf %7, %8 : vector<256x1xf32>
    %10 = arith.mulf %4, %4 : vector<256x1xf32>
    %11 = arith.subf %9, %10 : vector<256x1xf32>
    %cst_4 = arith.constant 0.000000e+00 : f32
    %12 = vector.broadcast %cst_4 : f32 to vector<256x1xf32>
    %13 = arith.maximumf %11, %12 : vector<256x1xf32>
    %c0_5 = arith.constant 0 : index
    %c0_6 = arith.constant 0 : index
    %14 = vector.load %arg2[%c0_5, %c0_6] : memref<256x1xf32, #tpu.memory_space<vmem>>, vector<256x1xf32>
    %cst_7 = arith.constant 9.99999974E-6 : f32
    %15 = vector.broadcast %cst_7 : f32 to vector<256x1xf32>
    %16 = arith.addf %13, %15 : vector<256x1xf32>
    %17 = math.rsqrt %16 : vector<256x1xf32>
    %18 = arith.mulf %14, %17 : vector<256x1xf32>
    %c0_8 = arith.constant 0 : index
    %c0_9 = arith.constant 0 : index
    %19 = vector.load %arg3[%c0_8, %c0_9] : memref<256x1xf32, #tpu.memory_space<vmem>>, vector<256x1xf32>
    %20 = arith.mulf %4, %18 : vector<256x1xf32>
    %21 = arith.subf %19, %20 : vector<256x1xf32>
    %22 = vector.broadcast %18 : vector<256x1xf32> to vector<256x196xf32>
    %23 = arith.mulf %0, %22 : vector<256x196xf32>
    %24 = vector.broadcast %21 : vector<256x1xf32> to vector<256x196xf32>
    %25 = arith.addf %23, %24 : vector<256x196xf32>
    %cst_10 = arith.constant 0.000000e+00 : f32
    %26 = vector.broadcast %cst_10 : f32 to vector<256x196xf32>
    %27 = arith.maximumf %25, %26 : vector<256x196xf32>
    %c0_11 = arith.constant 0 : index
    %c0_12 = arith.constant 0 : index
    %28 = vector.load %arg4[%c0_11, %c0_12] : memref<256x256xf32, #tpu.memory_space<vmem>>, vector<256x256xf32>
    %cst_13 = arith.constant dense<0.000000e+00> : vector<256x196xf32>
    %29 = tpu.matmul %28, %27, %cst_13 {dimension_numbers = #tpu.dot_dimension_numbers<[1], [0], [0], [1], [0, 0, 1, 1], [], []>} : vector<256x256xf32>, vector<256x196xf32>, vector<256x196xf32> -> vector<256x196xf32>
    %c0_14 = arith.constant 0 : index
    %c0_15 = arith.constant 0 : index
    %30 = vector.load %arg5[%c0_14, %c0_15] : memref<256x196xf32, #tpu.memory_space<vmem>>, vector<256x196xf32>
    tpu.vector_store %arg5[%c0_14, %c0_15], %29 {strides = array<i32>} : memref<256x196xf32, #tpu.memory_space<vmem>>, vector<256x196xf32>,
    return
  }
  func.func @transform_0(%arg0: i32) -> (i32, i32) {
    %c0_i32 = arith.constant 0 : i32
    %c0_i32_0 = arith.constant 0 : i32
    %c0_i32_1 = arith.constant 0 : i32
    return %c0_i32, %c0_i32_0 : i32, i32
  }
  func.func @transform_1(%arg0: i32) -> (i32, i32) {
    %c0_i32 = arith.constant 0 : i32
    %c0_i32_0 = arith.constant 0 : i32
    %c0_i32_1 = arith.constant 0 : i32
    return %c0_i32, %c0_i32_0 : i32, i32
  }
  func.func @transform_2(%arg0: i32) -> (i32, i32) {
    %c0_i32 = arith.constant 0 : i32
    %c0_i32_0 = arith.constant 0 : i32
    %c0_i32_1 = arith.constant 0 : i32
    return %c0_i32, %c0_i32_0 : i32, i32
  }
  func.func @transform_3(%arg0: i32) -> (i32, i32) {
    %c0_i32 = arith.constant 0 : i32
    %c0_i32_0 = arith.constant 0 : i32
    return %arg0, %c0_i32 : i32, i32
  }
  func.func @transform_4(%arg0: i32) -> (i32, i32) {
    %c0_i32 = arith.constant 0 : i32
    %c0_i32_0 = arith.constant 0 : i32
    return %arg0, %c0_i32 : i32, i32
  }
}

</mosaic_0001>

<bundles_post_ra>
// kernel: tpu_custom_call.1
= control target key start
LH: loop header
LB: loop body
LE: loop exit
PB: predicated region body
PF: predicated region fallthrough
CT: control target
= control target key end

     0   :  { %9 = vsyncpa [#allocation3], 0  ;;  %s3505_s0 = inlined_call_operand.vmem [shape: f32[256,196], index: 0, kind: input, shape index: {}]   ;;  %s3506_s1 = inlined_call_operand.vmem [shape: f32[256,1], index: 1, kind: input, shape index: {}]   ;;  %s3507_s2 = inlined_call_operand.vmem [shape: f32[256,1], index: 2, kind: input, shape index: {}]   ;;  %s3508_s3 = inlined_call_operand.hbm [shape: f32[1024,256], index: 3, kind: input, shape index: {}]   ;;  %s3509_s4 = inlined_call_operand.vmem [shape: f32[1024,196], index: 4, kind: output, shape index: {}]  }
   0x1   :  { %11 = vsyncpa [#allocation3 + $0x1], 0  ;;  %s2305_s15 = smov 0   ;;  %s2307_s16 = smov 0  }
   0x2   :  { %s2309_s17 = smov 0   ;;  %s2311_s18 = smov 0  }
   0x3 LB: > { %s1958_s19 = sadd.s32 4294967295, %s2274_s18   ;;  %s2325_s20 = sadd.s32 1, %s2274_s18   ;;  %s2274_s18 = sphi %s2311_s18, %s3518_s18   ;;  %s2270_s17 = sphi %s2309_s17, %s3517_s17   ;;  %s2266_s16 = sphi %s2307_s16, %s3516_s16   ;;  %s2262_s15 = sphi %s2305_s15, %s3515_s15  }
   0x4   : > { %s84_s21 = ssub.s32 %s2274_s18, %s2325_s20  ;;  %s87_s22 = sadd.s32 1, %s2270_s17 }
   0x5   : > { %p85_p0 = scmp.eq.s32.totalorder %s84_s21, 0  ;;  %p94_p1 = scmp.ne.s32.totalorder %s2270_s17, %s2266_s16 }
   0x6   : > { %p95_p2 = scmp.eq.s32.totalorder %s2274_s18, 0  ;;  %p100_p3 = scmp.ne.s32.totalorder %s2266_s16, %s2262_s15 }
   0x7   : > { %s2335_s23 = scalar_select %p85_p0, %s2270_s17, %s87_s22  }
   0x8   : > { %p96_p4 = por %p95_p2, %p94_p1  ;;  %p101_p5 = scmp.eq.s32.totalorder %s1958_s19, 0 }
   0x9   : > { %p2046_p6 = scmp.lt.s32.totalorder %s2274_s18, 4  ;;  %s159_s25 = sand.u32 1, %s2270_s17  }
   0xa   : > { %p2340_p7 = por %p101_p5, %p100_p3  ;;  %s1962_s26 = sshll.u32 %s159_s25, 9 }
   0xb   : > { %s1974_s27 = sshll.u32 %s2274_s18, 13  ;;  %s163_s5 = scalar_lea.vmem [#allocation2], %s1962_s26 }
   0xc   : > { %s3511_s24 = scalar_select %p2340_p7, 1, 0 }
   0xd   : > { %s2349_s30 = scalar_lea.hbm %s3508_s3, %s1974_s27  ;;  %s171_s6 = sshll.u32 %s163_s5, 4  ;;  %s2351_s6 = int_to_ptr.vmem [resolvable:$true] %s171_s6 }
   0xe   : > { %p2353_p8 = pnand %p2046_p6, %p96_p4  ;;  %s2358_s8 = scalar_lea.sflag [#allocation3], %s159_s25 }
   0xf   : > { %s2212_s9 = scalar_lea.hbm %s2349_s30, 8192  ;;  %s2217_s12 = scalar_lea.hbm %s3508_s3, 32768 }
  0x10   : > { %p2213_p10 = scmp.ne.s32.totalorder %s2349_s30, %s2212_s9  ;;  %p2214_p11 = pneg %p2353_p8 }
  0x11   : > { %p2218_p0 = scmp.lt.s32.totalorder %s2349_s30, %s3508_s3  ;;  %p2219_p1 = scmp.lt.s32.totalorder %s2217_s12, %s2212_s9 }
  0x12   : > { %p2215_p12 = pnand %p2214_p11, %p2213_p10 }
  0x13   : > { %p2220_p2 = por %p2219_p1, %p2218_p0 }
  0x14   : > { %p2216_p13 = pneg %p2215_p12 }
  0x16   : > { %p2221_p3 = pnand %p2220_p2, %p2216_p13 }
  0x18   : > { %2224 = shalt.err (!%p2221_p3)
}
  0x19   : > { %s2225_s15 = scalar_lea.vmem %s2351_s6, 8192  ;;  %s2276_s21 = smov [#allocation2]  }
  0x1a   : > { %p2226_p4 = scmp.ne.s32.totalorder %s2351_s6, %s2225_s15  ;;  %s2230_s22 = sshll.u32 %s2276_s21, 4  ;;  %s2231_s22 = int_to_ptr.vmem [resolvable:$false] %s2230_s22 }
  0x1b   : > { %s2232_s25 = scalar_lea.vmem %s2231_s22, 16384  ;;  %p2233_p10 = scmp.lt.s32.totalorder %s2351_s6, %s2231_s22 }
  0x1c   : > { %p2228_p5 = pnand %p2226_p4, %p2214_p11  ;;  %p2234_p12 = scmp.lt.s32.totalorder %s2232_s25, %s2225_s15 }
  0x1e   : > { %p2229_p6 = pneg %p2228_p5  ;;  %p2235_p9 = por %p2234_p12, %p2233_p10 }
  0x20   : > { %p2236_p7 = pnand %p2235_p9, %p2229_p6 }
  0x22   : > { %2239 = shalt.err (!%p2236_p7)
}
  0x23   : > { %s2277_s26 = smov 256   ;;  %s2278_s27 = smov 16  }
  0x24   : > { %2045 = dma.hbm_to_vmem [thread:$0]  (!%p2353_p8), %s2349_s30, 8192, %s2351_s6, %s2358_s8, %s2277_s26, %s2277_s26, %s2278_s27  }
  0x25   : > { %p179_p11 = scmp.lt.s32.totalorder %s2274_s18, 5  ;;  %p3513_p13 = scmp.ge.s32.totalorder %s2274_s18, 1 }
  0x27   : > { %p180_p0 = pnand %p3513_p13, %p179_p11 }
  0x28   : > { %s185_s28 = sand.u32 (!%p180_p0), 1, %s2266_s16   ;;  %p3514_p7 = scmp.ne.s32.totalorder (!%p180_p0), %s3511_s24, 0 }
  0x29   : > { %183 = sbr.rel (%p180_p0) target bundleno = 745 (0x2e9), region = 36  ;;  %s1967_s29 = sshll.u32 (!%p180_p0), %s185_s28, 9 }
  0x2a   : > { %s186_s5 = scalar_lea.sflag (!%p180_p0), [#allocation3], %s185_s28  ;;  %s2383_s9 = scalar_lea.vmem (!%p180_p0), [#allocation2], %s1967_s29 }
  0x2e   : > { %2257 = dma.done.wait (%p3514_p7), %s186_s5, 8192  }
  0x2f   : > { %2259 = vsyncadd (%p3514_p7), %s186_s5, 4294959104  ;;  %vm287_vm0 = vcmask 556032   ;;  %v253_v0 = vld [vmem:[%s3505_s0 + $0xf0] sm:$0xff]  ;;  %v254_v1 = vld [vmem:[%s3505_s0 + $0xf8] sm:$0xff]  ;;  %s1968_s8 = sshll.u32 %s1958_s19, 5 }
  0x30   : > { %v249_v2 = vld [vmem:[%s3505_s0 + $0xd0] sm:$0xff]  ;;  %v348_v3 = vsel %vm287_vm0, %v254_v1, 0.0  ;;  %v250_v4 = vld [vmem:[%s3505_s0 + $0xd8] sm:$0xff]  ;;  %v251_v5 = vld [vmem:[%s3505_s0 + $0xe0] sm:$0xff]  ;;  %v479_v23 = vmul.f32 %v254_v1, %v254_v1  ;;  %v478_v28 = vmul.f32 %v253_v0, %v253_v0  ;;  %p217_p8 = scmp.lt.s32.totalorder %s1968_s8, 127 }
  0x31   : > { %v252_v6 = vld [vmem:[%s3505_s0 + $0xe8] sm:$0xff]  ;;  %v349_v7 = vadd.f32 %v348_v3, %v253_v0  ;;  %v340_v8 = vsel %vm287_vm0, %v250_v4, 0.0  ;;  %v247_v10 = vld [vmem:[%s3505_s0 + $0xc0] sm:$0xff]  ;;  %v246_v15 = vld [vmem:[%s3505_s0 + $0xb8] sm:$0xff]  ;;  %v476_v17 = vmul.f32 %v251_v5, %v251_v5  ;;  %v475_v20 = vmul.f32 %v250_v4, %v250_v4 }
  0x32   : > { %v344_v9 = vsel %vm287_vm0, %v252_v6, 0.0  ;;  %v248_v11 = vld [vmem:[%s3505_s0 + $0xc8] sm:$0xff]  ;;  %v341_v12 = vadd.f32 %v340_v8, %v249_v2  ;;  %v477_v14 = vmul.f32 %v252_v6, %v252_v6  ;;  %v245_v21 = vld [vmem:[%s3505_s0 + $0xb0] sm:$0xff]  ;;  %v332_v22 = vsel %vm287_vm0, %v246_v15, 0.0  ;;  %v243_v37 = vld [vmem:[%s3505_s0 + $0xa0] sm:$0xff]  ;;  %s3520_s8 = smov (!%p217_p8, %s1968_s8), 127 }
  0x33   : > { %v336_v13 = vsel %vm287_vm0, %v248_v11, 0.0  ;;  %350 = vadd.xlane.f32.xlu0 %v349_v7  ;;  %v345_v16 = vadd.f32 %v344_v9, %v251_v5  ;;  %v474_v25 = vmul.f32 %v249_v2, %v249_v2  ;;  %v333_v26 = vadd.f32 %v332_v22, %v245_v21  ;;  %v244_v31 = vld [vmem:[%s3505_s0 + $0xa8] sm:$0xff]  ;;  %v242_v39 = vld [vmem:[%s3505_s0 + $0x98] sm:$0xff]  ;;  %v241_v45 = vld [vmem:[%s3505_s0 + $0x90] sm:$0xff]  ;;  %s1975_s11 = sshll.u32 %s3520_s8, 4 }
  0x34   : > { %342 = vadd.xlane.f32.xlu1 %v341_v12  ;;  %v337_v18 = vadd.f32 %v336_v13, %v247_v10  ;;  %v568_v19 = vsel %vm287_vm0, %v477_v14, 0.0  ;;  %v564_v27 = vsel %vm287_vm0, %v475_v20, 0.0  ;;  %v473_v29 = vmul.f32 %v248_v11, %v248_v11  ;;  %v240_v47 = vld [vmem:[%s3505_s0 + $0x88] sm:$0xff]  ;;  %v239_v53 = vld [vmem:[%s3505_s0 + $0x80] sm:$0xff]  ;;  %v238_v55 = vld [vmem:[%s3505_s0 + $0x78] sm:$0xff]  ;;  %s3394_s24 = scalar_lea.vmem %s3509_s4, %s1975_s11 }
  0x35   : > { %v569_v24 = vadd.f32 %v568_v19, %v476_v17  ;;  %v572_v30 = vsel %vm287_vm0, %v479_v23, 0.0  ;;  %v565_v32 = vadd.f32 %v564_v27, %v474_v25  ;;  %v472_v33 = vmul.f32 %v247_v10, %v247_v10  ;;  %v237_v61 = vld [vmem:[%s3505_s0 + $0x70] sm:$0xff]  ;;  %v236_v63 = vld [vmem:[%s3505_s0 + $0x68] sm:$0xff]  ;;  %v235_v5 = vld [vmem:[%s3505_s0 + $0x60] sm:$0xff] }
  0x36   : > { %v573_v34 = vadd.f32 %v572_v30, %v478_v28  ;;  %v560_v35 = vsel %vm287_vm0, %v473_v29, 0.0  ;;  %v471_v36 = vmul.f32 %v246_v15, %v246_v15  ;;  %v328_v38 = vsel %vm287_vm0, %v244_v31, 0.0  ;;  %v234_v7 = vld [vmem:[%s3505_s0 + $0x58] sm:$0xff]  ;;  %v233_v13 = vld [vmem:[%s3505_s0 + $0x50] sm:$0xff]  ;;  %v232_v15 = vld [vmem:[%s3505_s0 + $0x48] sm:$0xff] }
  0x37   : > { %346 = vadd.xlane.f32.xlu0 %v345_v16  ;;  %v561_v40 = vadd.f32 %v560_v35, %v472_v33  ;;  %v470_v41 = vmul.f32 %v245_v21, %v245_v21  ;;  %v329_v42 = vadd.f32 %v328_v38, %v243_v37  ;;  %v469_v44 = vmul.f32 %v244_v31, %v244_v31  ;;  %v231_v21 = vld [vmem:[%s3505_s0 + $0x40] sm:$0xff]  ;;  %v230_v23 = vld [vmem:[%s3505_s0 + $0x38] sm:$0xff]  ;;  %v229_v29 = vld [vmem:[%s3505_s0 + $0x30] sm:$0xff] }
  0x38   : > { %338 = vadd.xlane.f32.xlu1 %v337_v18  ;;  %v556_v43 = vsel %vm287_vm0, %v471_v36, 0.0  ;;  %v324_v46 = vsel %vm287_vm0, %v242_v39, 0.0  ;;  %v468_v49 = vmul.f32 %v243_v37, %v243_v37  ;;  %v467_v52 = vmul.f32 %v242_v39, %v242_v39  ;;  %v228_v31 = vld [vmem:[%s3505_s0 + $0x28] sm:$0xff]  ;;  %v227_v37 = vld [vmem:[%s3505_s0 + $0x20] sm:$0xff]  ;;  %v226_v39 = vld [vmem:[%s3505_s0 + $0x18] sm:$0xff] }
  0x39   : > { %v557_v48 = vadd.f32 %v556_v43, %v470_v41  ;;  %v325_v50 = vadd.f32 %v324_v46, %v241_v45  ;;  %v552_v51 = vsel %vm287_vm0, %v469_v44, 0.0  ;;  %v320_v54 = vsel %vm287_vm0, %v240_v47, 0.0  ;;  %v225_v46 = vld [vmem:[%s3505_s0 + $0x10] sm:$0xff] }
  0x3a   : > { %v553_v56 = vadd.f32 %v552_v51, %v468_v49  ;;  %v466_v57 = vmul.f32 %v241_v45, %v241_v45  ;;  %v321_v58 = vadd.f32 %v320_v54, %v239_v53  ;;  %v548_v59 = vsel %vm287_vm0, %v467_v52, 0.0  ;;  %v223_v54 = vld [vmem:[%s3505_s0] sm:$0xff] }
  0x3b   : > { %570 = vadd.xlane.f32.xlu0 %v569_v24  ;;  %v465_v60 = vmul.f32 %v240_v47, %v240_v47  ;;  %v316_v62 = vsel %vm287_vm0, %v238_v55, 0.0  ;;  %v464_v1 = vmul.f32 %v239_v53, %v239_v53  ;;  %v463_v4 = vmul.f32 %v238_v55, %v238_v55 }
  0x3c   : > { %334 = vadd.xlane.f32.xlu1 %v333_v26  ;;  %v549_v0 = vadd.f32 %v548_v59, %v466_v57  ;;  %v317_v2 = vadd.f32 %v316_v62, %v237_v61  ;;  %v312_v6 = vsel %vm287_vm0, %v236_v63, 0.0  ;;  %v462_v9 = vmul.f32 %v237_v61, %v237_v61  ;;  %v285_v62 = vld [vmem:[%s3505_s0 + $0x1f0] sm:$0xff] }
  0x3d   : > { %v544_v3 = vsel %vm287_vm0, %v465_v60, 0.0  ;;  %v313_v10 = vadd.f32 %v312_v6, %v235_v5  ;;  %v540_v11 = vsel %vm287_vm0, %v463_v4, 0.0  ;;  %v461_v12 = vmul.f32 %v236_v63, %v236_v63  ;;  %v283_v6 = vld [vmem:[%s3505_s0 + $0x1e0] sm:$0xff] }
  0x3e   : > { %v545_v8 = vadd.f32 %v544_v3, %v464_v1  ;;  %v308_v14 = vsel %vm287_vm0, %v234_v7, 0.0  ;;  %v541_v16 = vadd.f32 %v540_v11, %v462_v9  ;;  %v460_v17 = vmul.f32 %v235_v5, %v235_v5 }
  0x3f   : > { %566 = vadd.xlane.f32.xlu0 %v565_v32  ;;  %v309_v18 = vadd.f32 %v308_v14, %v233_v13  ;;  %v536_v19 = vsel %vm287_vm0, %v461_v12, 0.0  ;;  %v459_v20 = vmul.f32 %v234_v7, %v234_v7  ;;  %v304_v22 = vsel %vm287_vm0, %v232_v15, 0.0  ;;  %v281_v14 = vld [vmem:[%s3505_s0 + $0x1d0] sm:$0xff] }
  0x40   : > { %574 = vadd.xlane.f32.xlu1 %v573_v34  ;;  %v537_v24 = vadd.f32 %v536_v19, %v460_v17  ;;  %v458_v25 = vmul.f32 %v233_v13, %v233_v13  ;;  %v305_v26 = vadd.f32 %v304_v22, %v231_v21  ;;  %v457_v28 = vmul.f32 %v232_v15, %v232_v15  ;;  %v279_v22 = vld [vmem:[%s3505_s0 + $0x1c0] sm:$0xff] }
  0x41   : > { %v532_v27 = vsel %vm287_vm0, %v459_v20, 0.0  ;;  %v300_v30 = vsel %vm287_vm0, %v230_v23, 0.0  ;;  %v456_v33 = vmul.f32 %v231_v21, %v231_v21  ;;  %v455_v36 = vmul.f32 %v230_v23, %v230_v23 }
  0x42   : > { %v533_v32 = vadd.f32 %v532_v27, %v458_v25  ;;  %v301_v34 = vadd.f32 %v300_v30, %v229_v29  ;;  %v528_v35 = vsel %vm287_vm0, %v457_v28, 0.0  ;;  %v296_v38 = vsel %vm287_vm0, %v228_v31, 0.0  ;;  %v277_v30 = vld [vmem:[%s3505_s0 + $0x1b0] sm:$0xff] }
  0x43   : > { %562 = vadd.xlane.f32.xlu0 %v561_v40  ;;  %v529_v40 = vadd.f32 %v528_v35, %v456_v33  ;;  %v454_v41 = vmul.f32 %v229_v29, %v229_v29  ;;  %v524_v43 = vsel %vm287_vm0, %v455_v36, 0.0  ;;  %v453_v44 = vmul.f32 %v228_v31, %v228_v31 }
  0x44   : > { %330 = vadd.xlane.f32.xlu1 %v329_v42  ;;  %v297_v42 = vadd.f32 %v296_v38, %v227_v37  ;;  %v2279_v45 = vmov 0   ;;  %v292_v47 = vsel %vm287_vm0, %v226_v39, 0.0  ;;  %v451_v53 = vmul.f32 %v226_v39, %v226_v39  ;;  %v275_v38 = vld [vmem:[%s3505_s0 + $0x1a0] sm:$0xff] }
  0x45   : > { %2082 = vset.pattern.permute.xlu0 %v2279_v45  ;;  %2083 = vset.pattern.permute.xlu1 %v2279_v45  ;;  %v525_v49 = vadd.f32 %v524_v43, %v454_v41  ;;  %v293_v51 = vadd.f32 %v292_v47, %v225_v46  ;;  %v520_v52 = vsel %vm287_vm0, %v453_v44, 0.0 }
  0x46   : > { %v516_v60 = vsel %vm287_vm0, %v451_v53, 0.0 }
  0x47   : > { %558 = vadd.xlane.f32.xlu0 %v557_v48  ;;  %v224_v48 = vld [vmem:[%s3505_s0 + $0x8] sm:$0xff] }
  0x48   : > { %326 = vadd.xlane.f32.xlu1 %v325_v50  ;;  %v452_v50 = vmul.f32 %v227_v37, %v227_v37  ;;  %v288_v55 = vsel %vm287_vm0, %v224_v48, 0.0  ;;  %v449_v61 = vmul.f32 %v224_v48, %v224_v48  ;;  %v272_v48 = vld [vmem:[%s3505_s0 + $0x188] sm:$0xff] }
  0x49   : > { %v289_v59 = vadd.f32 %v288_v55, %v223_v54  ;;  %v384_v55 = vsel %vm287_vm0, %v272_v48, 0.0 }
  0x4a   : > { %v521_v57 = vadd.f32 %v520_v52, %v452_v50  ;;  %v512_v4 = vsel %vm287_vm0, %v449_v61, 0.0  ;;  %v500_v50 = vmul.f32 %v275_v38, %v275_v38  ;;  %v497_v61 = vmul.f32 %v272_v48, %v272_v48  ;;  %v256_v48 = vld [vmem:[%s3505_s0 + $0x108] sm:$0xff] }
  0x4b   : > { %554 = vadd.xlane.f32.xlu0 %v553_v56  ;;  %v286_v56 = vld [vmem:[%s3505_s0 + $0x1f8] sm:$0xff] }
  0x4c   : > { %322 = vadd.xlane.f32.xlu1 %v321_v58  ;;  %v450_v58 = vmul.f32 %v225_v46, %v225_v46  ;;  %v412_v63 = vsel %vm287_vm0, %v286_v56, 0.0  ;;  %v511_v5 = vmul.f32 %v286_v56, %v286_v56  ;;  %v273_v46 = vld [vmem:[%s3505_s0 + $0x190] sm:$0xff]  ;;  %v270_v56 = vld [vmem:[%s3505_s0 + $0x178] sm:$0xff] }
  0x4d   : > { %v413_v3 = vadd.f32 %v412_v63, %v285_v62  ;;  %v380_v63 = vsel %vm287_vm0, %v270_v56, 0.0 }
  0x4e   : > { %v517_v1 = vadd.f32 %v516_v60, %v450_v58  ;;  %v636_v12 = vsel %vm287_vm0, %v511_v5, 0.0  ;;  %v498_v58 = vmul.f32 %v273_v46, %v273_v46  ;;  %v495_v5 = vmul.f32 %v270_v56, %v270_v56 }
  0x4f   : > { %550 = vadd.xlane.f32.xlu0 %v549_v0  ;;  %v284_v0 = vld [vmem:[%s3505_s0 + $0x1e8] sm:$0xff]  ;;  %v481_v56 = vmul.f32 %v256_v48, %v256_v48 }
  0x50   : > { %318 = vadd.xlane.f32.xlu1 %v317_v2  ;;  %v448_v2 = vmul.f32 %v223_v54, %v223_v54  ;;  %v408_v7 = vsel %vm287_vm0, %v284_v0, 0.0  ;;  %v509_v13 = vmul.f32 %v284_v0, %v284_v0  ;;  %v271_v54 = vld [vmem:[%s3505_s0 + $0x180] sm:$0xff]  ;;  %v268_v0 = vld [vmem:[%s3505_s0 + $0x168] sm:$0xff] }
  0x51   : > { %v409_v11 = vadd.f32 %v408_v7, %v283_v6  ;;  %v376_v7 = vsel %vm287_vm0, %v268_v0, 0.0 }
  0x52   : > { %v513_v9 = vadd.f32 %v512_v4, %v448_v2  ;;  %v632_v20 = vsel %vm287_vm0, %v509_v13, 0.0  ;;  %v496_v2 = vmul.f32 %v271_v54, %v271_v54  ;;  %v608_v4 = vsel %vm287_vm0, %v497_v61, 0.0 }
  0x53   : > { %546 = vadd.xlane.f32.xlu0 %v545_v8  ;;  %v282_v8 = vld [vmem:[%s3505_s0 + $0x1d8] sm:$0xff]  ;;  %v493_v13 = vmul.f32 %v268_v0, %v268_v0 }
  0x54   : > { %314 = vadd.xlane.f32.xlu1 %v313_v10  ;;  %v510_v10 = vmul.f32 %v285_v62, %v285_v62  ;;  %v404_v15 = vsel %vm287_vm0, %v282_v8, 0.0  ;;  %v507_v21 = vmul.f32 %v282_v8, %v282_v8  ;;  %v269_v62 = vld [vmem:[%s3505_s0 + $0x170] sm:$0xff]  ;;  %v266_v8 = vld [vmem:[%s3505_s0 + $0x158] sm:$0xff] }
  0x55   : > { %v405_v19 = vadd.f32 %v404_v15, %v281_v14  ;;  %v372_v15 = vsel %vm287_vm0, %v266_v8, 0.0 }
  0x56   : > { %v637_v17 = vadd.f32 %v636_v12, %v510_v10  ;;  %v628_v28 = vsel %vm287_vm0, %v507_v21, 0.0  ;;  %v494_v10 = vmul.f32 %v269_v62, %v269_v62  ;;  %v604_v12 = vsel %vm287_vm0, %v495_v5, 0.0 }
  0x57   : > { %542 = vadd.xlane.f32.xlu0 %v541_v16  ;;  %v280_v16 = vld [vmem:[%s3505_s0 + $0x1c8] sm:$0xff]  ;;  %v491_v21 = vmul.f32 %v266_v8, %v266_v8 }
  0x58   : > { %310 = vadd.xlane.f32.xlu1 %v309_v18  ;;  %v508_v18 = vmul.f32 %v283_v6, %v283_v6  ;;  %v400_v23 = vsel %vm287_vm0, %v280_v16, 0.0  ;;  %v505_v29 = vmul.f32 %v280_v16, %v280_v16  ;;  %v267_v6 = vld [vmem:[%s3505_s0 + $0x160] sm:$0xff]  ;;  %v264_v16 = vld [vmem:[%s3505_s0 + $0x148] sm:$0xff] }
  0x59   : > { %v401_v27 = vadd.f32 %v400_v23, %v279_v22  ;;  %v368_v23 = vsel %vm287_vm0, %v264_v16, 0.0 }
  0x5a   : > { %v633_v25 = vadd.f32 %v632_v20, %v508_v18  ;;  %v624_v36 = vsel %vm287_vm0, %v505_v29, 0.0  ;;  %v492_v18 = vmul.f32 %v267_v6, %v267_v6  ;;  %v600_v20 = vsel %vm287_vm0, %v493_v13, 0.0 }
  0x5b   : > { %538 = vadd.xlane.f32.xlu0 %v537_v24  ;;  %v278_v24 = vld [vmem:[%s3505_s0 + $0x1b8] sm:$0xff]  ;;  %v489_v29 = vmul.f32 %v264_v16, %v264_v16 }
  0x5c   : > { %306 = vadd.xlane.f32.xlu1 %v305_v26  ;;  %v506_v26 = vmul.f32 %v281_v14, %v281_v14  ;;  %v396_v31 = vsel %vm287_vm0, %v278_v24, 0.0  ;;  %v503_v37 = vmul.f32 %v278_v24, %v278_v24  ;;  %v265_v14 = vld [vmem:[%s3505_s0 + $0x150] sm:$0xff]  ;;  %v262_v24 = vld [vmem:[%s3505_s0 + $0x138] sm:$0xff] }
  0x5d   : > { %v397_v35 = vadd.f32 %v396_v31, %v277_v30  ;;  %v364_v31 = vsel %vm287_vm0, %v262_v24, 0.0 }
  0x5e   : > { %v629_v33 = vadd.f32 %v628_v28, %v506_v26  ;;  %v620_v44 = vsel %vm287_vm0, %v503_v37, 0.0  ;;  %v490_v26 = vmul.f32 %v265_v14, %v265_v14  ;;  %v596_v28 = vsel %vm287_vm0, %v491_v21, 0.0 }
  0x5f   : > { %534 = vadd.xlane.f32.xlu0 %v533_v32  ;;  %v276_v32 = vld [vmem:[%s3505_s0 + $0x1a8] sm:$0xff]  ;;  %v487_v37 = vmul.f32 %v262_v24, %v262_v24 }
  0x60   : > { %302 = vadd.xlane.f32.xlu1 %v301_v34  ;;  %v504_v34 = vmul.f32 %v279_v22, %v279_v22  ;;  %v392_v39 = vsel %vm287_vm0, %v276_v32, 0.0  ;;  %v501_v45 = vmul.f32 %v276_v32, %v276_v32  ;;  %v263_v22 = vld [vmem:[%s3505_s0 + $0x140] sm:$0xff]  ;;  %v260_v32 = vld [vmem:[%s3505_s0 + $0x128] sm:$0xff] }
  0x61   : > { %v393_v43 = vadd.f32 %v392_v39, %v275_v38  ;;  %v259_v38 = vld [vmem:[%s3505_s0 + $0x120] sm:$0xff]  ;;  %v360_v39 = vsel %vm287_vm0, %v260_v32, 0.0 }
  0x62   : > { %v625_v41 = vadd.f32 %v624_v36, %v504_v34  ;;  %v616_v52 = vsel %vm287_vm0, %v501_v45, 0.0  ;;  %v488_v34 = vmul.f32 %v263_v22, %v263_v22  ;;  %v592_v36 = vsel %vm287_vm0, %v489_v29, 0.0 }
  0x63   : > { %530 = vadd.xlane.f32.xlu0 %v529_v40  ;;  %v274_v40 = vld [vmem:[%s3505_s0 + $0x198] sm:$0xff]  ;;  %v485_v45 = vmul.f32 %v260_v32, %v260_v32 }
  0x64   : > { %298 = vadd.xlane.f32.xlu1 %v297_v42  ;;  %v502_v42 = vmul.f32 %v277_v30, %v277_v30  ;;  %v388_v47 = vsel %vm287_vm0, %v274_v40, 0.0  ;;  %v499_v53 = vmul.f32 %v274_v40, %v274_v40  ;;  %v261_v30 = vld [vmem:[%s3505_s0 + $0x130] sm:$0xff]  ;;  %v258_v40 = vld [vmem:[%s3505_s0 + $0x118] sm:$0xff] }
  0x66   : > { %v612_v60 = vsel %vm287_vm0, %v499_v53, 0.0  ;;  %v483_v53 = vmul.f32 %v258_v40, %v258_v40 }
  0x67   : > { %526 = vadd.xlane.f32.xlu0 %v525_v49  ;;  %v621_v49 = vadd.f32 %v620_v44, %v502_v42  ;;  %v486_v42 = vmul.f32 %v261_v30, %v261_v30  ;;  %v588_v44 = vsel %vm287_vm0, %v487_v37, 0.0 }
  0x68   : > { %294 = vadd.xlane.f32.xlu1 %v293_v51  ;;  %v389_v51 = vadd.f32 %v388_v47, %v273_v46  ;;  %v257_v46 = vld [vmem:[%s3505_s0 + $0x110] sm:$0xff]  ;;  %v356_v47 = vsel %vm287_vm0, %v258_v40, 0.0 }
  0x6b   : > { %522 = vadd.xlane.f32.xlu0 %v521_v57  ;;  %v617_v57 = vadd.f32 %v616_v52, %v500_v50  ;;  %v484_v50 = vmul.f32 %v259_v38, %v259_v38  ;;  %v584_v52 = vsel %vm287_vm0, %v485_v45, 0.0 }
  0x6c   : > { %290 = vadd.xlane.f32.xlu1 %v289_v59  ;;  %v385_v59 = vadd.f32 %v384_v55, %v271_v54  ;;  %v255_v54 = vld [vmem:[%s3505_s0 + $0x100] sm:$0xff]  ;;  %v352_v55 = vsel %vm287_vm0, %v256_v48, 0.0 }
  0x6d   : > { %v480_v61 = vmul.f32 %v255_v54, %v255_v54 }
  0x6f   : > { %518 = vadd.xlane.f32.xlu0 %v517_v1  ;;  %v613_v1 = vadd.f32 %v612_v60, %v498_v58  ;;  %v482_v58 = vmul.f32 %v257_v46, %v257_v46  ;;  %v580_v60 = vsel %vm287_vm0, %v483_v53, 0.0  ;;  %v782_v53 = vld [vmem:[%s3506_s1 + $0x70] sm:$0xff] }
  0x70   : > { %414 = vadd.xlane.f32.xlu1 %v413_v3  ;;  %v381_v3 = vadd.f32 %v380_v63, %v269_v62  ;;  %v576_v62 = vsel %vm287_vm0, %v481_v56, 0.0 }
  0x71   : > { %v581_v63 = vadd.f32 %v580_v60, %v482_v58  ;;  %v577_v0 = vadd.f32 %v576_v62, %v480_v61 }
  0x73   : > { %514 = vadd.xlane.f32.xlu0 %v513_v9  ;;  %v609_v9 = vadd.f32 %v608_v4, %v496_v2 }
  0x74   : > { %410 = vadd.xlane.f32.xlu1 %v409_v11  ;;  %v377_v11 = vadd.f32 %v376_v7, %v267_v6 }
  0x77   : > { %638 = vadd.xlane.f32.xlu0 %v637_v17  ;;  %v605_v17 = vadd.f32 %v604_v12, %v494_v10 }
  0x78   : > { %406 = vadd.xlane.f32.xlu1 %v405_v19  ;;  %v373_v19 = vadd.f32 %v372_v15, %v265_v14 }
  0x7b   : > { %634 = vadd.xlane.f32.xlu0 %v633_v25  ;;  %v601_v25 = vadd.f32 %v600_v20, %v492_v18 }
  0x7c   : > { %402 = vadd.xlane.f32.xlu1 %v401_v27  ;;  %v369_v27 = vadd.f32 %v368_v23, %v263_v22 }
  0x7f   : > { %630 = vadd.xlane.f32.xlu0 %v629_v33  ;;  %v597_v33 = vadd.f32 %v596_v28, %v490_v26 }
  0x80   : > { %398 = vadd.xlane.f32.xlu1 %v397_v35  ;;  %v365_v35 = vadd.f32 %v364_v31, %v261_v30 }
  0x83   : > { %626 = vadd.xlane.f32.xlu0 %v625_v41  ;;  %v593_v41 = vadd.f32 %v592_v36, %v488_v34 }
  0x84   : > { %394 = vadd.xlane.f32.xlu1 %v393_v43  ;;  %v361_v43 = vadd.f32 %v360_v39, %v259_v38 }
  0x87   : > { %622 = vadd.xlane.f32.xlu0 %v621_v49  ;;  %v589_v49 = vadd.f32 %v588_v44, %v486_v42 }
  0x88   : > { %390 = vadd.xlane.f32.xlu1 %v389_v51  ;;  %v357_v51 = vadd.f32 %v356_v47, %v257_v46 }
  0x8b   : > { %618 = vadd.xlane.f32.xlu0 %v617_v57  ;;  %v585_v57 = vadd.f32 %v584_v52, %v484_v50 }
  0x8c   : > { %386 = vadd.xlane.f32.xlu1 %v385_v59  ;;  %v353_v59 = vadd.f32 %v352_v55, %v255_v54 }
  0x8f   : > { %614 = vadd.xlane.f32.xlu0 %v613_v1 }
  0x90   : > { %382 = vadd.xlane.f32.xlu1 %v381_v3 }
  0x93   : > { %610 = vadd.xlane.f32.xlu0 %v609_v9 }
  0x94   : > { %378 = vadd.xlane.f32.xlu1 %v377_v11 }
  0x97   : > { %606 = vadd.xlane.f32.xlu0 %v605_v17 }
  0x98   : > { %374 = vadd.xlane.f32.xlu1 %v373_v19 }
  0x9b   : > { %602 = vadd.xlane.f32.xlu0 %v601_v25 }
  0x9c   : > { %370 = vadd.xlane.f32.xlu1 %v369_v27 }
  0x9f   : > { %598 = vadd.xlane.f32.xlu0 %v597_v33 }
  0xa0   : > { %366 = vadd.xlane.f32.xlu1 %v365_v35 }
  0xa3   : > { %594 = vadd.xlane.f32.xlu0 %v593_v41 }
  0xa4   : > { %362 = vadd.xlane.f32.xlu1 %v361_v43 }
  0xa7   : > { %590 = vadd.xlane.f32.xlu0 %v589_v49 }
  0xa8   : > { %358 = vadd.xlane.f32.xlu1 %v357_v51 }
  0xab   : > { %586 = vadd.xlane.f32.xlu0 %v585_v57 }
  0xac   : > { %354 = vadd.xlane.f32.xlu1 %v353_v59 }
  0xaf   : > { %582 = vadd.xlane.f32.xlu0 %v581_v63 }
  0xb0   : > { %578 = vadd.xlane.f32.xlu1 %v577_v0  ;;  %v781_v0 = vld [vmem:[%s3506_s1 + $0x68] sm:$0xff] }
  0xbc   : > { %v351_v1 = vpop.xlane.xlu0 %350 }
  0xbd   : > { %v343_v2 = vpop.xlane.xlu1 %342  ;;  %v2651_v11 = vmul.f32 0.0051020407, %v351_v1 }
  0xbe   : > { %v2647_v7 = vmul.f32 0.0051020407, %v343_v2 }
  0xbf   : > { %v687_v19 = vmul.f32 %v2651_v11, %v2651_v11 }
  0xc0   : > { %v347_v3 = vpop.xlane.xlu0 %346  ;;  %v685_v15 = vmul.f32 %v2647_v7, %v2647_v7 }
  0xc1   : > { %v2645_v4 = vmul.f32 0.0051020407, %v347_v3  ;;  %v339_v5 = vpop.xlane.xlu1 %338 }
  0xc2   : > { %v2653_v13 = vmul.f32 0.0051020407, %v339_v5  ;;  %v783_v5 = vld [vmem:[%s3506_s1 + $0x78] sm:$0xff] }
  0xc3   : > { %v686_v8 = vmul.f32 %v2645_v4, %v2645_v4 }
  0xc4   : > { %v571_v6 = vpop.xlane.xlu0 %570  ;;  %v684_v23 = vmul.f32 %v2653_v13, %v2653_v13 }
  0xc5   : > { %v654_v9 = vmul.f32 0.0051020407, %v571_v6  ;;  %v335_v10 = vpop.xlane.xlu1 %334 }
  0xc6   : > { %v2661_v26 = vmul.f32 0.0051020407, %v335_v10 }
  0xc7   : > { %v718_v12 = vsub.f32 %v654_v9, %v686_v8 }
  0xc8   : > { %v567_v14 = vpop.xlane.xlu0 %566  ;;  %v683_v36 = vmul.f32 %v2661_v26, %v2661_v26 }
  0xc9   : > { %v750_v16 = vmax.f32 %v718_v12, 0.0  ;;  %v653_v17 = vmul.f32 0.0051020407, %v567_v14  ;;  %v575_v18 = vpop.xlane.xlu1 %574 }
  0xca   : > { %v655_v20 = vmul.f32 0.0051020407, %v575_v18  ;;  %v780_v18 = vld [vmem:[%s3506_s1 + $0x60] sm:$0xff] }
  0xcb   : > { %v814_v21 = vadd.f32 1e-05, %v750_v16  ;;  %v717_v22 = vsub.f32 %v653_v17, %v685_v15 }
  0xcc   : > { %v719_v24 = vsub.f32 %v655_v20, %v687_v19  ;;  %v563_v25 = vpop.xlane.xlu0 %562 }
  0xcd   : > { %2084 = vrsqrt.f32 %v814_v21  ;;  %v749_v27 = vmax.f32 %v717_v22, 0.0  ;;  %v652_v28 = vmul.f32 0.0051020407, %v563_v25  ;;  %v331_v29 = vpop.xlane.xlu1 %330 }
  0xce   : > { %v751_v30 = vmax.f32 %v719_v24, 0.0  ;;  %v2663_v33 = vmul.f32 0.0051020407, %v331_v29 }
  0xcf   : > { %v813_v31 = vadd.f32 1e-05, %v749_v27  ;;  %v716_v32 = vsub.f32 %v652_v28, %v684_v23 }
  0xd0   : > { %v815_v34 = vadd.f32 1e-05, %v751_v30  ;;  %v559_v35 = vpop.xlane.xlu0 %558  ;;  %v682_v41 = vmul.f32 %v2663_v33, %v2663_v33  ;;  %v779_v30 = vld [vmem:[%s3506_s1 + $0x58] sm:$0xff] }
  0xd1   : > { %2086 = vrsqrt.f32 %v813_v31  ;;  %v748_v37 = vmax.f32 %v716_v32, 0.0  ;;  %v651_v38 = vmul.f32 0.0051020407, %v559_v35  ;;  %v327_v39 = vpop.xlane.xlu1 %326 }
  0xd2   : > { %2088 = vrsqrt.f32 %v815_v34  ;;  %v2669_v43 = vmul.f32 0.0051020407, %v327_v39 }
  0xd3   : > { %v812_v40 = vadd.f32 1e-05, %v748_v37  ;;  %v715_v42 = vsub.f32 %v651_v38, %v683_v36 }
  0xd4   : > { %v555_v44 = vpop.xlane.xlu0 %554  ;;  %v681_v50 = vmul.f32 %v2669_v43, %v2669_v43 }
  0xd5   : > { %2090 = vrsqrt.f32 %v812_v40  ;;  %v747_v45 = vmax.f32 %v715_v42, 0.0  ;;  %v650_v46 = vmul.f32 0.0051020407, %v555_v44  ;;  %v323_v47 = vpop.xlane.xlu1 %322  ;;  %v911_v42 = vld [vmem:[%s3507_s2 + $0x78] sm:$0xff] }
  0xd6   : > { %v2671_v48 = vmul.f32 0.0051020407, %v323_v47 }
  0xd7   : > { %v811_v49 = vadd.f32 1e-05, %v747_v45  ;;  %v714_v51 = vsub.f32 %v650_v46, %v682_v41  ;;  %v778_v45 = vld [vmem:[%s3506_s1 + $0x50] sm:$0xff] }
  0xd8   : > { %v551_v52 = vpop.xlane.xlu0 %550  ;;  %v680_v58 = vmul.f32 %v2671_v48, %v2671_v48 }
  0xd9   : > { %2092 = vrsqrt.f32 %v811_v49  ;;  %v746_v54 = vmax.f32 %v714_v51, 0.0  ;;  %v649_v55 = vmul.f32 0.0051020407, %v551_v52  ;;  %v319_v56 = vpop.xlane.xlu1 %318 }
  0xda   : > { %v2085_v57 = vpop.eup %2084  ;;  %v2680_v61 = vmul.f32 0.0051020407, %v319_v56 }
  0xdb   : > { %v810_v59 = vadd.f32 1e-05, %v746_v54  ;;  %v713_v60 = vsub.f32 %v649_v55, %v681_v50  ;;  %v878_v62 = vmul.f32 %v2085_v57, %v782_v53  ;;  %v910_v57 = vld [vmem:[%s3507_s2 + $0x70] sm:$0xff] }
  0xdc   : > { %v547_v63 = vpop.xlane.xlu0 %546  ;;  %v679_v12 = vmul.f32 %v2680_v61, %v2680_v61 }
  0xdd   : > { %2094 = vrsqrt.f32 %v810_v59  ;;  %v745_v1 = vmax.f32 %v713_v60, 0.0  ;;  %v648_v2 = vmul.f32 0.0051020407, %v547_v63  ;;  %v315_v3 = vpop.xlane.xlu1 %314  ;;  %1064 = vperm.xlu1 %2083, %v878_v62   ;;  %v942_v52 = vmul.f32 %v878_v62, %v2645_v4  ;;  %v777_v59 = vld [vmem:[%s3506_s1 + $0x48] sm:$0xff] }
  0xde   : > { %v2087_v6 = vpop.eup %2086  ;;  %v2688_v8 = vmul.f32 0.0051020407, %v315_v3 }
  0xdf   : > { %v2089_v9 = vpop.eup %2088  ;;  %v809_v10 = vadd.f32 1e-05, %v745_v1  ;;  %v712_v14 = vsub.f32 %v648_v2, %v680_v58  ;;  %v877_v15 = vmul.f32 %v2087_v6, %v781_v0  ;;  %v974_v1 = vsub.f32 %v910_v57, %v942_v52 }
  0xe0   : > { %v543_v16 = vpop.xlane.xlu0 %542  ;;  %v879_v17 = vmul.f32 %v2089_v9, %v783_v5  ;;  %v678_v23 = vmul.f32 %v2688_v8, %v2688_v8 }
  0xe1   : > { %2096 = vrsqrt.f32 %v809_v10  ;;  %v744_v19 = vmax.f32 %v712_v14, 0.0  ;;  %v647_v20 = vmul.f32 0.0051020407, %v543_v16  ;;  %v311_v21 = vpop.xlane.xlu1 %310  ;;  %1059 = vperm.xlu1 %2083, %v877_v15   ;;  %v941_v2 = vmul.f32 %v877_v15, %v2647_v7  ;;  %v909_v10 = vld [vmem:[%s3507_s2 + $0x68] sm:$0xff]  ;;  %v776_v14 = vld [vmem:[%s3506_s1 + $0x40] sm:$0xff] }
  0xe2   : > { %v2091_v22 = vpop.eup %2090  ;;  %1069 = vperm.xlu0 %2082, %v879_v17   ;;  %v2697_v27 = vmul.f32 0.0051020407, %v311_v21  ;;  %v943_v37 = vmul.f32 %v879_v17, %v2651_v11 }
  0xe3   : > { %v808_v24 = vadd.f32 1e-05, %v744_v19  ;;  %v711_v25 = vsub.f32 %v647_v20, %v679_v12  ;;  %v876_v28 = vmul.f32 %v2091_v22, %v780_v18  ;;  %v973_v19 = vsub.f32 %v909_v10, %v941_v2 }
  0xe4   : > { %v539_v29 = vpop.xlane.xlu0 %538  ;;  %v677_v39 = vmul.f32 %v2697_v27, %v2697_v27  ;;  %v975_v51 = vsub.f32 %v911_v42, %v943_v37 }
  0xe5   : > { %2098 = vrsqrt.f32 %v808_v24  ;;  %v743_v31 = vmax.f32 %v711_v25, 0.0  ;;  %v646_v32 = vmul.f32 0.0051020407, %v539_v29  ;;  %v307_v34 = vpop.xlane.xlu1 %306  ;;  %1054 = vperm.xlu1 %2083, %v876_v28   ;;  %v940_v20 = vmul.f32 %v876_v28, %v2653_v13  ;;  %v908_v25 = vld [vmem:[%s3507_s2 + $0x60] sm:$0xff] }
  0xe6   : > { %v2093_v35 = vpop.eup %2092  ;;  %v2702_v36 = vmul.f32 0.0051020407, %v307_v34 }
  0xe7   : > { %v807_v38 = vadd.f32 1e-05, %v743_v31  ;;  %v710_v40 = vsub.f32 %v646_v32, %v678_v23  ;;  %v2707_v41 = vmul.f32 %v2093_v35, %v779_v30  ;;  %v775_v30 = vld [vmem:[%s3506_s1 + $0x38] sm:$0xff]  ;;  %v972_v35 = vsub.f32 %v908_v25, %v940_v20 }
  0xe8   : > { %v535_v44 = vpop.xlane.xlu0 %534  ;;  %v676_v50 = vmul.f32 %v2702_v36, %v2702_v36 }
  0xe9   : > { %2100 = vrsqrt.f32 %v807_v38  ;;  %v742_v46 = vmax.f32 %v710_v40, 0.0  ;;  %v645_v47 = vmul.f32 0.0051020407, %v535_v44  ;;  %v303_v11 = vpop.xlane.xlu1 %302  ;;  %1049 = vperm.xlu1 %2083, %v2707_v41   ;;  %v939_v37 = vmul.f32 %v2707_v41, %v2661_v26  ;;  %v907_v44 = vld [vmem:[%s3507_s2 + $0x58] sm:$0xff] }
  0xea   : > { %v2095_v49 = vpop.eup %2094  ;;  %v2719_v55 = vmul.f32 0.0051020407, %v303_v11 }
  0xeb   : > { %v806_v53 = vadd.f32 1e-05, %v742_v46  ;;  %v709_v54 = vsub.f32 %v645_v47, %v677_v39  ;;  %v2721_v56 = vmul.f32 %v2095_v49, %v778_v45  ;;  %v774_v46 = vld [vmem:[%s3506_s1 + $0x30] sm:$0xff] }
  0xec   : > { %v531_v58 = vpop.xlane.xlu0 %530  ;;  %v675_v5 = vmul.f32 %v2719_v55, %v2719_v55 }
  0xed   : > { %2102 = vrsqrt.f32 %v806_v53  ;;  %v741_v60 = vmax.f32 %v709_v54, 0.0  ;;  %v644_v63 = vmul.f32 0.0051020407, %v531_v58  ;;  %v299_v0 = vpop.xlane.xlu1 %298  ;;  %1044 = vperm.xlu0 %2082, %v2721_v56   ;;  %1293 = vperm.xlu1 %2083, %v975_v51   ;;  %v938_v51 = vmul.f32 %v2721_v56, %v2663_v33  ;;  %v906_v58 = vld [vmem:[%s3507_s2 + $0x50] sm:$0xff] }
  0xee   : > { %v2097_v4 = vpop.eup %2096  ;;  %v2730_v62 = vmul.f32 0.0051020407, %v299_v0 }
  0xef   : > { %v805_v3 = vadd.f32 1e-05, %v741_v60  ;;  %v708_v6 = vsub.f32 %v644_v63, %v676_v50  ;;  %v2735_v9 = vmul.f32 %v2097_v4, %v777_v59  ;;  %v971_v50 = vsub.f32 %v907_v44, %v939_v37  ;;  %v773_v60 = vld [vmem:[%s3506_s1 + $0x28] sm:$0xff] }
  0xf0   : > { %v527_v12 = vpop.xlane.xlu0 %526  ;;  %v674_v18 = vmul.f32 %v2730_v62, %v2730_v62 }
  0xf1   : > { %2104 = vrsqrt.f32 %v805_v3  ;;  %v740_v16 = vmax.f32 %v708_v6, 0.0  ;;  %v643_v17 = vmul.f32 0.0051020407, %v527_v12  ;;  %v295_v7 = vpop.xlane.xlu1 %294  ;;  %1039 = vperm.xlu0 %2082, %v2735_v9   ;;  %1288 = vperm.xlu1 %2083, %v974_v1   ;;  %v970_v1 = vsub.f32 %v906_v58, %v938_v51  ;;  %v905_v12 = vld [vmem:[%s3507_s2 + $0x48] sm:$0xff] }
  0xf2   : > { %v2099_v15 = vpop.eup %2098  ;;  %v2747_v23 = vmul.f32 0.0051020407, %v295_v7  ;;  %v937_v2 = vmul.f32 %v2735_v9, %v2669_v43 }
  0xf3   : > { %v804_v21 = vadd.f32 1e-05, %v740_v16  ;;  %v707_v22 = vsub.f32 %v643_v17, %v675_v5  ;;  %v2749_v24 = vmul.f32 %v2099_v15, %v776_v14  ;;  %v772_v16 = vld [vmem:[%s3506_s1 + $0x20] sm:$0xff] }
  0xf4   : > { %v523_v29 = vpop.xlane.xlu0 %522  ;;  %v673_v39 = vmul.f32 %v2747_v23, %v2747_v23 }
  0xf5   : > { %2106 = vrsqrt.f32 %v804_v21  ;;  %v739_v31 = vmax.f32 %v707_v22, 0.0  ;;  %v642_v32 = vmul.f32 0.0051020407, %v523_v29  ;;  %v291_v34 = vpop.xlane.xlu1 %290  ;;  %1034 = vperm.xlu0 %2082, %v2749_v24   ;;  %1283 = vperm.xlu1 %2083, %v973_v19   ;;  %v936_v19 = vmul.f32 %v2749_v24, %v2671_v48  ;;  %v904_v29 = vld [vmem:[%s3507_s2 + $0x40] sm:$0xff] }
  0xf6   : > { %v2101_v13 = vpop.eup %2100  ;;  %v2758_v28 = vmul.f32 0.0051020407, %v291_v34 }
  0xf7   : > { %v803_v38 = vadd.f32 1e-05, %v739_v31  ;;  %v706_v40 = vsub.f32 %v642_v32, %v674_v18  ;;  %v2764_v42 = vmul.f32 %v2101_v13, %v775_v30  ;;  %v969_v18 = vsub.f32 %v905_v12, %v937_v2  ;;  %v771_v31 = vld [vmem:[%s3506_s1 + $0x18] sm:$0xff] }
  0xf8   : > { %v519_v45 = vpop.xlane.xlu0 %518  ;;  %v672_v49 = vmul.f32 %v2758_v28, %v2758_v28 }
  0xf9   : > { %2108 = vrsqrt.f32 %v803_v38  ;;  %v738_v47 = vmax.f32 %v706_v40, 0.0  ;;  %v641_v11 = vmul.f32 0.0051020407, %v519_v45  ;;  %v415_v26 = vpop.xlane.xlu1 %414  ;;  %1029 = vperm.xlu0 %2082, %v2764_v42   ;;  %1278 = vperm.xlu1 %2083, %v972_v35   ;;  %v968_v35 = vsub.f32 %v904_v29, %v936_v19  ;;  %v903_v45 = vld [vmem:[%s3507_s2 + $0x38] sm:$0xff] }
  0xfa   : > { %v2103_v41 = vpop.eup %2102  ;;  %v2777_v54 = vmul.f32 0.0051020407, %v415_v26  ;;  %v935_v37 = vmul.f32 %v2764_v42, %v2680_v61 }
  0xfb   : > { %v802_v52 = vadd.f32 1e-05, %v738_v47  ;;  %v705_v53 = vsub.f32 %v641_v11, %v673_v39  ;;  %v2779_v57 = vmul.f32 %v2103_v41, %v774_v46  ;;  %v770_v47 = vld [vmem:[%s3506_s1 + $0x10] sm:$0xff] }
  0xfc   : > { %v515_v59 = vpop.xlane.xlu0 %514  ;;  %v703_v5 = vmul.f32 %v2777_v54, %v2777_v54 }
  0xfd   : > { %2110 = vrsqrt.f32 %v802_v52  ;;  %v737_v63 = vmax.f32 %v705_v53, 0.0  ;;  %v640_v0 = vmul.f32 0.0051020407, %v515_v59  ;;  %v411_v4 = vpop.xlane.xlu1 %410  ;;  %1024 = vperm.xlu0 %2082, %v2779_v57   ;;  %1273 = vperm.xlu1 %2083, %v971_v50   ;;  %v934_v50 = vmul.f32 %v2779_v57, %v2688_v8  ;;  %v902_v59 = vld [vmem:[%s3507_s2 + $0x30] sm:$0xff] }
  0xfe   : > { %v2105_v33 = vpop.eup %2104  ;;  %v2788_v56 = vmul.f32 0.0051020407, %v411_v4 }
  0xff   : > { %v801_v3 = vadd.f32 1e-05, %v737_v63  ;;  %v704_v6 = vsub.f32 %v640_v0, %v672_v49  ;;  %v2794_v10 = vmul.f32 %v2105_v33, %v773_v60  ;;  %v967_v49 = vsub.f32 %v903_v45, %v935_v37  ;;  %v769_v63 = vld [vmem:[%s3506_s1 + $0x8] sm:$0xff] }
 0x100   : > { %v639_v14 = vpop.xlane.xlu0 %638  ;;  %v702_v15 = vmul.f32 %v2788_v56, %v2788_v56 }
 0x101   : > { %2112 = vrsqrt.f32 %v801_v3  ;;  %v736_v17 = vmax.f32 %v704_v6, 0.0  ;;  %v671_v7 = vmul.f32 0.0051020407, %v639_v14  ;;  %v407_v43 = vpop.xlane.xlu1 %406  ;;  %1019 = vperm.xlu0 %2082, %v2794_v10   ;;  %1268 = vperm.xlu1 %2083, %v970_v1   ;;  %v966_v1 = vsub.f32 %v902_v59, %v934_v50  ;;  %v901_v14 = vld [vmem:[%s3507_s2 + $0x28] sm:$0xff] }
 0x102   : > { %v2107_v9 = vpop.eup %2106  ;;  %v2807_v22 = vmul.f32 0.0051020407, %v407_v43  ;;  %v933_v2 = vmul.f32 %v2794_v10, %v2697_v27 }
 0x103   : > { %v800_v20 = vadd.f32 1e-05, %v736_v17  ;;  %v735_v21 = vsub.f32 %v671_v7, %v703_v5  ;;  %v2809_v25 = vmul.f32 %v2107_v9, %v772_v16  ;;  %v768_v17 = vld [vmem:[%s3506_s1] sm:$0xff] }
 0x104   : > { %v635_v30 = vpop.xlane.xlu0 %634  ;;  %v701_v39 = vmul.f32 %v2807_v22, %v2807_v22 }
 0x105   : > { %2114 = vrsqrt.f32 %v800_v20  ;;  %v767_v32 = vmax.f32 %v735_v21, 0.0  ;;  %v670_v34 = vmul.f32 0.0051020407, %v635_v30  ;;  %v403_v13 = vpop.xlane.xlu1 %402  ;;  %1014 = vperm.xlu0 %2082, %v2809_v25   ;;  %1263 = vperm.xlu1 %2083, %v969_v18   ;;  %v932_v18 = vmul.f32 %v2809_v25, %v2702_v36  ;;  %v900_v30 = vld [vmem:[%s3507_s2 + $0x20] sm:$0xff] }
 0x106   : > { %v2109_v48 = vpop.eup %2108  ;;  %v2818_v24 = vmul.f32 0.0051020407, %v403_v13 }
 0x107   : > { %v831_v38 = vadd.f32 1e-05, %v767_v32  ;;  %v734_v40 = vsub.f32 %v670_v34, %v702_v15  ;;  %v2824_v44 = vmul.f32 %v2109_v48, %v771_v31  ;;  %v965_v15 = vsub.f32 %v901_v14, %v933_v2  ;;  %v799_v32 = vld [vmem:[%s3506_s1 + $0xf8] sm:$0xff] }
 0x108   : > { %v631_v46 = vpop.xlane.xlu0 %630  ;;  %v700_v41 = vmul.f32 %v2818_v24, %v2818_v24 }
 0x109   : > { %2116 = vrsqrt.f32 %v831_v38  ;;  %v766_v11 = vmax.f32 %v734_v40, 0.0  ;;  %v669_v26 = vmul.f32 0.0051020407, %v631_v46  ;;  %v399_v61 = vpop.xlane.xlu1 %398  ;;  %1009 = vperm.xlu0 %2082, %v2824_v44   ;;  %1258 = vperm.xlu1 %2083, %v968_v35   ;;  %v964_v35 = vsub.f32 %v900_v30, %v932_v18  ;;  %v899_v46 = vld [vmem:[%s3507_s2 + $0x18] sm:$0xff] }
 0x10a   : > { %v2111_v42 = vpop.eup %2110  ;;  %v2837_v53 = vmul.f32 0.0051020407, %v399_v61  ;;  %v931_v37 = vmul.f32 %v2824_v44, %v2719_v55 }
 0x10b   : > { %v830_v51 = vadd.f32 1e-05, %v766_v11  ;;  %v733_v52 = vsub.f32 %v669_v26, %v701_v39  ;;  %v866_v58 = vmul.f32 %v2111_v42, %v770_v47  ;;  %v798_v11 = vld [vmem:[%s3506_s1 + $0xf0] sm:$0xff] }
 0x10c   : > { %v627_v60 = vpop.xlane.xlu0 %626  ;;  %v699_v5 = vmul.f32 %v2837_v53, %v2837_v53 }
 0x10d   : > { %2118 = vrsqrt.f32 %v830_v51  ;;  %v765_v0 = vmax.f32 %v733_v52, 0.0  ;;  %v668_v4 = vmul.f32 0.0051020407, %v627_v60  ;;  %v395_v33 = vpop.xlane.xlu1 %394  ;;  %1004 = vperm.xlu0 %2082, %v866_v58   ;;  %1253 = vperm.xlu1 %2083, %v967_v49   ;;  %v930_v44 = vmul.f32 %v866_v58, %v2730_v62  ;;  %v898_v60 = vld [vmem:[%s3507_s2 + $0x10] sm:$0xff] }
 0x10e   : > { %v2113_v8 = vpop.eup %2112  ;;  %v2845_v57 = vmul.f32 0.0051020407, %v395_v33  ;;  %v963_v49 = vsub.f32 %v899_v46, %v931_v37 }
 0x10f   : > { %v829_v3 = vadd.f32 1e-05, %v765_v0  ;;  %v732_v6 = vsub.f32 %v668_v4, %v700_v41  ;;  %v865_v12 = vmul.f32 %v2113_v8, %v769_v63  ;;  %v797_v0 = vld [vmem:[%s3506_s1 + $0xe8] sm:$0xff]  ;;  %v962_v2 = vsub.f32 %v898_v60, %v930_v44 }
 0x110   : > { %v623_v16 = vpop.xlane.xlu0 %622  ;;  %v698_v10 = vmul.f32 %v2845_v57, %v2845_v57 }
 0x111   : > { %2120 = vrsqrt.f32 %v829_v3  ;;  %v764_v7 = vmax.f32 %v732_v6, 0.0  ;;  %v667_v43 = vmul.f32 0.0051020407, %v623_v16  ;;  %v391_v9 = vpop.xlane.xlu1 %390  ;;  %999 = vperm.xlu0 %2082, %v865_v12   ;;  %1248 = vperm.xlu1 %2083, %v966_v1   ;;  %v929_v8 = vmul.f32 %v865_v12, %v2747_v23  ;;  %v897_v16 = vld [vmem:[%s3507_s2 + $0x8] sm:$0xff] }
 0x112   : > { %v2115_v27 = vpop.eup %2114  ;;  %v2861_v21 = vmul.f32 0.0051020407, %v391_v9 }
 0x113   : > { %v828_v19 = vadd.f32 1e-05, %v764_v7  ;;  %v731_v20 = vsub.f32 %v667_v43, %v699_v5  ;;  %v864_v29 = vmul.f32 %v2115_v27, %v768_v17  ;;  %v796_v7 = vld [vmem:[%s3506_s1 + $0xe0] sm:$0xff] }
 0x114   : > { %v619_v31 = vpop.xlane.xlu0 %618  ;;  %v697_v39 = vmul.f32 %v2861_v21, %v2861_v21 }
 0x115   : > { %2122 = vrsqrt.f32 %v828_v19  ;;  %v763_v34 = vmax.f32 %v731_v20, 0.0  ;;  %v666_v13 = vmul.f32 0.0051020407, %v619_v31  ;;  %v387_v48 = vpop.xlane.xlu1 %386  ;;  %1243 = vperm.xlu1 %2083, %v965_v15   ;;  %994 = vperm.xlu0 %2082, %v864_v29   ;;  %v928_v27 = vmul.f32 %v864_v29, %v2758_v28  ;;  %v896_v31 = vld [vmem:[%s3507_s2] sm:$0xff] }
 0x116   : > { %v2117_v36 = vpop.eup %2116  ;;  %v2869_v25 = vmul.f32 0.0051020407, %v387_v48  ;;  %v961_v15 = vsub.f32 %v897_v16, %v929_v8 }
 0x117   : > { %v827_v38 = vadd.f32 1e-05, %v763_v34  ;;  %v730_v40 = vsub.f32 %v666_v13, %v698_v10  ;;  %v895_v45 = vmul.f32 %v2117_v36, %v799_v32  ;;  %v795_v34 = vld [vmem:[%s3506_s1 + $0xd8] sm:$0xff]  ;;  %v960_v37 = vsub.f32 %v896_v31, %v928_v27 }
 0x118   : > { %v615_v47 = vpop.xlane.xlu0 %614  ;;  %v696_v41 = vmul.f32 %v2869_v25, %v2869_v25 }
 0x119   : > { %2124 = vrsqrt.f32 %v827_v38  ;;  %v762_v26 = vmax.f32 %v730_v40, 0.0  ;;  %v665_v61 = vmul.f32 0.0051020407, %v615_v47  ;;  %v383_v42 = vpop.xlane.xlu1 %382  ;;  %1238 = vperm.xlu1 %2083, %v964_v35   ;;  %1149 = vperm.xlu0 %2082, %v895_v45   ;;  %v959_v36 = vmul.f32 %v895_v45, %v2777_v54  ;;  %v927_v47 = vld [vmem:[%s3507_s2 + $0xf8] sm:$0xff] }
 0x11a   : > { %v2119_v55 = vpop.eup %2118  ;;  %v2884_v52 = vmul.f32 0.0051020407, %v383_v42 }
 0x11b   : > { %v826_v50 = vadd.f32 1e-05, %v762_v26  ;;  %v729_v51 = vsub.f32 %v665_v61, %v697_v39  ;;  %v894_v59 = vmul.f32 %v2119_v55, %v798_v11  ;;  %v794_v26 = vld [vmem:[%s3506_s1 + $0xd0] sm:$0xff] }
 0x11c   : > { %v611_v63 = vpop.xlane.xlu0 %610  ;;  %v695_v5 = vmul.f32 %v2884_v52, %v2884_v52 }
 0x11d   : > { %2126 = vrsqrt.f32 %v826_v50  ;;  %v761_v62 = vmax.f32 %v729_v51, 0.0  ;;  %v664_v58 = vmul.f32 0.0051020407, %v611_v63  ;;  %v379_v4 = vpop.xlane.xlu1 %378  ;;  %1233 = vperm.xlu1 %2083, %v963_v49   ;;  %1144 = vperm.xlu0 %2082, %v894_v59   ;;  %v958_v55 = vmul.f32 %v894_v59, %v2788_v56  ;;  %v926_v63 = vld [vmem:[%s3507_s2 + $0xf0] sm:$0xff] }
 0x11e   : > { %v2121_v33 = vpop.eup %2120  ;;  %v2893_v1 = vmul.f32 0.0051020407, %v379_v4 }
 0x11f   : > { %v825_v3 = vadd.f32 1e-05, %v761_v62  ;;  %v728_v6 = vsub.f32 %v664_v58, %v696_v41  ;;  %v893_v14 = vmul.f32 %v2121_v33, %v797_v0  ;;  %v991_v41 = vsub.f32 %v927_v47, %v959_v36  ;;  %v793_v62 = vld [vmem:[%s3506_s1 + $0xc8] sm:$0xff] }
 0x120   : > { %v607_v17 = vpop.xlane.xlu0 %606  ;;  %v694_v10 = vmul.f32 %v2893_v1, %v2893_v1 }
 0x121   : > { %2128 = vrsqrt.f32 %v825_v3  ;;  %v760_v23 = vmax.f32 %v728_v6, 0.0  ;;  %v663_v12 = vmul.f32 0.0051020407, %v607_v17  ;;  %v375_v43 = vpop.xlane.xlu1 %374  ;;  %1228 = vperm.xlu1 %2083, %v962_v2   ;;  %1139 = vperm.xlu0 %2082, %v893_v14   ;;  %v957_v33 = vmul.f32 %v893_v14, %v2807_v22  ;;  %v925_v17 = vld [vmem:[%s3507_s2 + $0xe8] sm:$0xff] }
 0x122   : > { %v2123_v9 = vpop.eup %2122  ;;  %v2906_v20 = vmul.f32 0.0051020407, %v375_v43  ;;  %v990_v2 = vsub.f32 %v926_v63, %v958_v55 }
 0x123   : > { %v824_v18 = vadd.f32 1e-05, %v760_v23  ;;  %v727_v19 = vsub.f32 %v663_v12, %v695_v5  ;;  %v892_v30 = vmul.f32 %v2123_v9, %v796_v7  ;;  %v792_v23 = vld [vmem:[%s3506_s1 + $0xc0] sm:$0xff] }
 0x124   : > { %v603_v32 = vpop.xlane.xlu0 %602  ;;  %v693_v39 = vmul.f32 %v2906_v20, %v2906_v20 }
 0x125   : > { %2130 = vrsqrt.f32 %v824_v18  ;;  %v759_v28 = vmax.f32 %v727_v19, 0.0  ;;  %v662_v29 = vmul.f32 0.0051020407, %v603_v32  ;;  %v371_v13 = vpop.xlane.xlu1 %370  ;;  %1223 = vperm.xlu1 %2083, %v961_v15   ;;  %1134 = vperm.xlu0 %2082, %v892_v30   ;;  %v956_v9 = vmul.f32 %v892_v30, %v2818_v24  ;;  %v924_v32 = vld [vmem:[%s3507_s2 + $0xe0] sm:$0xff] }
 0x126   : > { %v2125_v48 = vpop.eup %2124  ;;  %v2915_v35 = vmul.f32 0.0051020407, %v371_v13 }
 0x127   : > { %v823_v38 = vadd.f32 1e-05, %v759_v28  ;;  %v726_v40 = vsub.f32 %v662_v29, %v694_v10  ;;  %v891_v46 = vmul.f32 %v2125_v48, %v795_v34  ;;  %v989_v10 = vsub.f32 %v925_v17, %v957_v33  ;;  %v791_v28 = vld [vmem:[%s3506_s1 + $0xb8] sm:$0xff] }
 0x128   : > { %v599_v11 = vpop.xlane.xlu0 %598  ;;  %v692_v44 = vmul.f32 %v2915_v35, %v2915_v35 }
 0x129   : > { %2132 = vrsqrt.f32 %v823_v38  ;;  %v758_v54 = vmax.f32 %v726_v40, 0.0  ;;  %v661_v45 = vmul.f32 0.0051020407, %v599_v11  ;;  %v367_v61 = vpop.xlane.xlu1 %366  ;;  %1218 = vperm.xlu1 %2083, %v960_v37   ;;  %1129 = vperm.xlu0 %2082, %v891_v46   ;;  %v955_v48 = vmul.f32 %v891_v46, %v2837_v53  ;;  %v923_v11 = vld [vmem:[%s3507_s2 + $0xd8] sm:$0xff]  ;;  %v790_v53 = vld [vmem:[%s3506_s1 + $0xb0] sm:$0xff] }
 0x12a   : > { %v2127_v42 = vpop.eup %2126  ;;  %v2928_v51 = vmul.f32 0.0051020407, %v367_v61  ;;  %v988_v37 = vsub.f32 %v924_v32, %v956_v9  ;;  %v918_v32 = vld [vmem:[%s3507_s2 + $0xb0] sm:$0xff] }
 0x12b   : > { %v822_v49 = vadd.f32 1e-05, %v758_v54  ;;  %v725_v50 = vsub.f32 %v661_v45, %v693_v39  ;;  %v2930_v60 = vmul.f32 %v2127_v42, %v794_v26 }
 0x12c   : > { %v595_v0 = vpop.xlane.xlu0 %594  ;;  %v691_v5 = vmul.f32 %v2928_v51, %v2928_v51 }
 0x12d   : > { %2134 = vrsqrt.f32 %v822_v49  ;;  %v757_v56 = vmax.f32 %v725_v50, 0.0  ;;  %v660_v59 = vmul.f32 0.0051020407, %v595_v0  ;;  %v363_v58 = vpop.xlane.xlu1 %362  ;;  %1373 = vperm.xlu1 %2083, %v991_v41   ;;  %1124 = vperm.xlu0 %2082, %v2930_v60   ;;  %v954_v63 = vmul.f32 %v2930_v60, %v2845_v57 }
 0x12e   : > { %v2129_v4 = vpop.eup %2128  ;;  %v2940_v8 = vmul.f32 0.0051020407, %v363_v58 }
 0x12f   : > { %v821_v3 = vadd.f32 1e-05, %v757_v56  ;;  %v724_v6 = vsub.f32 %v660_v59, %v692_v44  ;;  %v2944_v16 = vmul.f32 %v2129_v4, %v793_v62  ;;  %v987_v44 = vsub.f32 %v923_v11, %v955_v48  ;;  %v922_v62 = vld [vmem:[%s3507_s2 + $0xd0] sm:$0xff]  ;;  %v789_v56 = vld [vmem:[%s3506_s1 + $0xa8] sm:$0xff] }
 0x130   : > { %v591_v7 = vpop.xlane.xlu0 %590  ;;  %v690_v27 = vmul.f32 %v2940_v8, %v2940_v8 }
 0x131   : > { %2136 = vrsqrt.f32 %v821_v3  ;;  %v756_v22 = vmax.f32 %v724_v6, 0.0  ;;  %v659_v14 = vmul.f32 0.0051020407, %v591_v7  ;;  %v359_v12 = vpop.xlane.xlu1 %358  ;;  %1368 = vperm.xlu1 %2083, %v990_v2   ;;  %1119 = vperm.xlu0 %2082, %v2944_v16   ;;  %v986_v2 = vsub.f32 %v922_v62, %v954_v63  ;;  %v788_v6 = vld [vmem:[%s3506_s1 + $0xa0] sm:$0xff]  ;;  %v2149_v63 = vld [vmem:[%s3505_s0 + $0xf8] sm:$0xff] }
 0x132   : > { %v2131_v43 = vpop.eup %2130  ;;  %v2956_v19 = vmul.f32 0.0051020407, %v359_v12  ;;  %v953_v57 = vmul.f32 %v2944_v16, %v2861_v21  ;;  %v920_v21 = vld [vmem:[%s3507_s2 + $0xc0] sm:$0xff]  ;;  %v787_v16 = vld [vmem:[%s3506_s1 + $0x98] sm:$0xff] }
 0x133   : > { %v820_v15 = vadd.f32 1e-05, %v756_v22  ;;  %v723_v18 = vsub.f32 %v659_v14, %v691_v5  ;;  %v888_v31 = vmul.f32 %v2131_v43, %v792_v23  ;;  %v921_v5 = vld [vmem:[%s3507_s2 + $0xc8] sm:$0xff] }
 0x134   : > { %v587_v34 = vpop.xlane.xlu0 %586  ;;  %v689_v39 = vmul.f32 %v2956_v19, %v2956_v19  ;;  %v985_v7 = vsub.f32 %v921_v5, %v953_v57 }
 0x135   : > { %2138 = vrsqrt.f32 %v820_v15  ;;  %v755_v24 = vmax.f32 %v723_v18, 0.0  ;;  %v658_v30 = vmul.f32 0.0051020407, %v587_v34  ;;  %v355_v29 = vpop.xlane.xlu1 %354  ;;  %1363 = vperm.xlu1 %2083, %v989_v10   ;;  %1114 = vperm.xlu0 %2082, %v888_v31   ;;  %v952_v22 = vmul.f32 %v888_v31, %v2869_v25  ;;  %v786_v25 = vld [vmem:[%s3506_s1 + $0x90] sm:$0xff]  ;;  %v784_v34 = vld [vmem:[%s3506_s1 + $0x80] sm:$0xff] }
 0x136   : > { %v2133_v13 = vpop.eup %2132  ;;  %v2965_v36 = vmul.f32 0.0051020407, %v355_v29 }
 0x137   : > { %v819_v38 = vadd.f32 1e-05, %v755_v24  ;;  %v722_v40 = vsub.f32 %v658_v30, %v690_v27  ;;  %v887_v47 = vmul.f32 %v2133_v13, %v791_v28  ;;  %v984_v12 = vsub.f32 %v920_v21, %v952_v22  ;;  %v919_v27 = vld [vmem:[%s3507_s2 + $0xb8] sm:$0xff]  ;;  %v917_v13 = vld [vmem:[%s3507_s2 + $0xa8] sm:$0xff]  ;;  %v2152_v22 = vld [vmem:[%s3505_s0 + $0xd0] sm:$0xff] }
 0x138   : > { %v688_v26 = vmul.f32 %v2965_v36, %v2965_v36  ;;  %v583_v54 = vpop.xlane.xlu0 %582 }
 0x139   : > { %2140 = vrsqrt.f32 %v819_v38  ;;  %v754_v46 = vmax.f32 %v722_v40, 0.0  ;;  %v657_v45 = vmul.f32 0.0051020407, %v583_v54  ;;  %v579_v61 = vpop.xlane.xlu1 %578  ;;  %1358 = vperm.xlu1 %2083, %v988_v37   ;;  %1109 = vperm.xlu0 %2082, %v887_v47   ;;  %v951_v9 = vmul.f32 %v887_v47, %v2884_v52  ;;  %v785_v52 = vld [vmem:[%s3506_s1 + $0x88] sm:$0xff]  ;;  %v916_v40 = vld [vmem:[%s3507_s2 + $0xa0] sm:$0xff] }
 0x13a   : > { %v2135_v42 = vpop.eup %2134  ;;  %v656_v55 = vmul.f32 0.0051020407, %v579_v61 }
 0x13b   : > { %v818_v41 = vadd.f32 1e-05, %v754_v46  ;;  %v721_v49 = vsub.f32 %v657_v45, %v689_v39  ;;  %v886_v50 = vmul.f32 %v2135_v42, %v790_v53  ;;  %v983_v15 = vsub.f32 %v919_v27, %v951_v9  ;;  %v914_v45 = vld [vmem:[%s3507_s2 + $0x90] sm:$0xff] }
 0x13c   : > { %v720_v0 = vsub.f32 %v656_v55, %v688_v26  ;;  %v913_v55 = vld [vmem:[%s3507_s2 + $0x88] sm:$0xff] }
 0x13d   : > { %2142 = vrsqrt.f32 %v818_v41  ;;  %v753_v59 = vmax.f32 %v721_v49, 0.0  ;;  %1353 = vperm.xlu1 %2083, %v987_v44   ;;  %1104 = vperm.xlu0 %2082, %v886_v50   ;;  %v950_v31 = vmul.f32 %v886_v50, %v2893_v1  ;;  %v2148_v49 = vld [vmem:[%s3505_s0 + $0xf0] sm:$0xff] }
 0x13e   : > { %v2137_v58 = vpop.eup %2136  ;;  %v752_v4 = vmax.f32 %v720_v0, 0.0 }
 0x13f   : > { %v817_v33 = vadd.f32 1e-05, %v753_v59  ;;  %v885_v3 = vmul.f32 %v2137_v58, %v789_v56  ;;  %v982_v30 = vsub.f32 %v918_v32, %v950_v31  ;;  %v1505_v56 = vld [vmem:[%s2383_s9 + $0x8] sm:$0xff] }
 0x140   : > { %v816_v60 = vadd.f32 1e-05, %v752_v4  ;;  %v1537_v59 = vld [vmem:[%s2383_s9 + $0x108] sm:$0xff]  ;;  %1632 = vmatprep.mubr.f32.mxu0 %v1505_v56  ;;  %v2162_v56 = vld [vmem:[%s3505_s0 + $0x80] sm:$0xff] }
 0x141   : > { %2144 = vrsqrt.f32 %v817_v33  ;;  %1348 = vperm.xlu1 %2083, %v986_v2   ;;  %1099 = vperm.xlu0 %2082, %v885_v3   ;;  %v949_v1 = vmul.f32 %v885_v3, %v2906_v20  ;;  %v912_v20 = vld [vmem:[%s3507_s2 + $0x80] sm:$0xff]  ;;  %v2151_v3 = vld [vmem:[%s3505_s0 + $0xe8] sm:$0xff] }
 0x142   : > { %v2139_v17 = vpop.eup %2138  ;;  %2146 = vrsqrt.f32 %v816_v60  ;;  %1728 = vmatprep.mubr.f32.mxu1 %v1537_v59  ;;  %v2150_v33 = vld [vmem:[%s3505_s0 + $0xe0] sm:$0xff]  ;;  %v2155_v31 = vld [vmem:[%s3505_s0 + $0xc8] sm:$0xff] }
 0x143   : > { %v884_v23 = vmul.f32 %v2139_v17, %v788_v6  ;;  %v981_v37 = vsub.f32 %v917_v13, %v949_v1  ;;  %v2156_v1 = vld [vmem:[%s3505_s0 + $0xb0] sm:$0xff] }
 0x145   : > { %1343 = vperm.xlu1 %2083, %v985_v7   ;;  %1094 = vperm.xlu0 %2082, %v884_v23   ;;  %v948_v38 = vmul.f32 %v884_v23, %v2915_v35  ;;  %v915_v35 = vld [vmem:[%s3507_s2 + $0x98] sm:$0xff] }
 0x146   : > { %v2141_v14 = vpop.eup %2140 }
 0x147   : > { %v883_v43 = vmul.f32 %v2141_v14, %v787_v16  ;;  %v980_v47 = vsub.f32 %v916_v40, %v948_v38  ;;  %v2153_v16 = vld [vmem:[%s3505_s0 + $0xd8] sm:$0xff] }
 0x149   : > { %1338 = vperm.xlu1 %2083, %v984_v12   ;;  %1089 = vperm.xlu0 %2082, %v883_v43   ;;  %v947_v26 = vmul.f32 %v883_v43, %v2928_v51 }
 0x14a   : > { %v2143_v10 = vpop.eup %2142 }
 0x14b   : > { %v882_v18 = vmul.f32 %v2143_v10, %v786_v25 }
 0x14d   : > { %1333 = vperm.xlu1 %2083, %v983_v15   ;;  %1084 = vperm.xlu0 %2082, %v882_v18   ;;  %v946_v53 = vmul.f32 %v882_v18, %v2940_v8  ;;  %v2154_v15 = vld [vmem:[%s3505_s0 + $0xc0] sm:$0xff] }
 0x14e   : > { %v2145_v28 = vpop.eup %2144 }
 0x14f   : > { %v2147_v24 = vpop.eup %2146  ;;  %v881_v29 = vmul.f32 %v2145_v28, %v785_v52  ;;  %v978_v61 = vsub.f32 %v914_v45, %v946_v53 }
 0x150   : > { %v880_v48 = vmul.f32 %v2147_v24, %v784_v34 }
 0x151   : > { %1328 = vperm.xlu1 %2083, %v982_v30   ;;  %1079 = vperm.xlu0 %2082, %v881_v29   ;;  %v945_v51 = vmul.f32 %v881_v29, %v2956_v19 }
 0x152   : > { %v944_v39 = vmul.f32 %v880_v48, %v2965_v36  ;;  %v979_v36 = vsub.f32 %v915_v35, %v947_v26  ;;  %v2158_v26 = vld [vmem:[%s3505_s0 + $0xa0] sm:$0xff]  ;;  %v2159_v35 = vld [vmem:[%s3505_s0 + $0xa8] sm:$0xff] }
 0x153   : > { %v977_v44 = vsub.f32 %v913_v55, %v945_v51  ;;  %v2160_v55 = vld [vmem:[%s3505_s0 + $0x90] sm:$0xff] }
 0x154   : > { %v976_v11 = vsub.f32 %v912_v20, %v944_v39 }
 0x155   : > { %1323 = vperm.xlu1 %2083, %v981_v37   ;;  %1074 = vperm.xlu0 %2082, %v880_v48   ;;  %v2157_v48 = vld [vmem:[%s3505_s0 + $0xb8] sm:$0xff] }
 0x158   : > { %v1065_v54 = vpop.permute.xlu1 %1064 }
 0x159   : > { %1318 = vperm.xlu1 %2083, %v980_v47   ;;  %1298 = vperm.xlu0 %2082, %v976_v11   ;;  %v1180_v2 = vmul.f32 %v2150_v33, %v1065_v54  ;;  %v1181_v57 = vmul.f32 %v2151_v3, %v1065_v54 }
 0x15c   : > { %v1060_v46 = vpop.permute.xlu1 %1059 }
 0x15d   : > { %1313 = vperm.xlu1 %2083, %v979_v36   ;;  %v1070_v41 = vpop.permute.xlu0 %1069  ;;  %v1178_v21 = vmul.f32 %v2152_v22, %v1060_v46  ;;  %v1179_v14 = vmul.f32 %v2153_v16, %v1060_v46 }
 0x15e   : > { %v1182_v50 = vmul.f32 %v2148_v49, %v1070_v41  ;;  %v1183_v19 = vmul.f32 %v2149_v63, %v1070_v41  ;;  %v2161_v41 = vld [vmem:[%s3505_s0 + $0x98] sm:$0xff] }
 0x160   : > { %v1055_v42 = vpop.permute.xlu1 %1054 }
 0x161   : > { %1308 = vperm.xlu1 %2083, %v978_v61   ;;  %v1176_v18 = vmul.f32 %v2154_v15, %v1055_v42  ;;  %v1177_v32 = vmul.f32 %v2155_v31, %v1055_v42 }
 0x164   : > { %v1050_v8 = vpop.permute.xlu1 %1049 }
 0x165   : > { %1303 = vperm.xlu1 %2083, %v977_v44   ;;  %v1174_v13 = vmul.f32 %v2156_v1, %v1050_v8  ;;  %v1175_v37 = vmul.f32 %v2157_v48, %v1050_v8 }
 0x168   : > { %v3047_v0 = vpop.permute.xlu0 %1044  ;;  %v1294_v62 = vpop.permute.xlu1 %1293 }
 0x169   : > { %v1406_v58 = vadd.f32 %v1294_v62, %v1182_v50  ;;  %v1407_v4 = vadd.f32 %v1294_v62, %v1183_v19  ;;  %v1172_v54 = vmul.f32 %v2158_v26, %v3047_v0  ;;  %v1173_v36 = vmul.f32 %v2159_v35, %v3047_v0 }
 0x16b   : > { %v1471_v60 = vmax.f32 %v1407_v4, 0.0  ;;  %v1470_v5 = vmax.f32 %v1406_v58, 0.0  ;;  %v2163_v58 = vld [vmem:[%s3505_s0 + $0x88] sm:$0xff] }
 0x16c   : > { %v3057_v6 = vpop.permute.xlu0 %1039  ;;  %v1289_v17 = vpop.permute.xlu1 %1288 }
 0x16d   : > { %v1404_v7 = vadd.f32 %v1289_v17, %v1180_v2  ;;  %v1405_v23 = vadd.f32 %v1289_v17, %v1181_v57  ;;  %1568 = vmatprep.subr.mxu0 %v1471_v60  ;;  %1976 = vmatprep.subr.mxu1 %v1471_v60  ;;  %v1170_v44 = vmul.f32 %v2160_v55, %v3057_v6 }
 0x16e   : > { %1569 = vmatpush1.msra.mxu0 %v1470_v5  ;;  %2008 = vmatpush1.msra.mxu1 %v1470_v5  ;;  %v1171_v8 = vmul.f32 %v2161_v41, %v3057_v6  ;;  %v2164_v6 = vld [vmem:[%s3505_s0 + $0x70] sm:$0xff] }
 0x16f   : > { %v1468_v12 = vmax.f32 %v1404_v7, 0.0  ;;  %v1469_v43 = vmax.f32 %v1405_v23, 0.0  ;;  %v2165_v7 = vld [vmem:[%s3505_s0 + $0x78] sm:$0xff] }
 0x170   : > { %v3065_v9 = vpop.permute.xlu0 %1034  ;;  %v1284_v27 = vpop.permute.xlu1 %1283 }
 0x171   : > { %v1402_v25 = vadd.f32 %v1284_v27, %v1178_v21  ;;  %v1403_v10 = vadd.f32 %v1284_v27, %v1179_v14  ;;  %1570 = vmatprep.subr.mxu0 %v1469_v43  ;;  %1977 = vmatprep.subr.mxu1 %v1469_v43  ;;  %v1168_v59 = vmul.f32 %v2162_v56, %v3065_v9 }
 0x172   : > { %1571 = vmatpush1.msra.mxu0 %v1468_v12  ;;  %2009 = vmatpush1.msra.mxu1 %v1468_v12  ;;  %v1169_v4 = vmul.f32 %v2163_v58, %v3065_v9  ;;  %v2166_v9 = vld [vmem:[%s3505_s0 + $0x60] sm:$0xff] }
 0x173   : > { %v1466_v52 = vmax.f32 %v1402_v25, 0.0  ;;  %v1467_v34 = vmax.f32 %v1403_v10, 0.0  ;;  %v2167_v25 = vld [vmem:[%s3505_s0 + $0x68] sm:$0xff] }
 0x174   : > { %v3073_v28 = vpop.permute.xlu0 %1029  ;;  %v1279_v24 = vpop.permute.xlu1 %1278 }
 0x175   : > { %v1400_v30 = vadd.f32 %v1279_v24, %v1176_v18  ;;  %v1401_v29 = vadd.f32 %v1279_v24, %v1177_v32  ;;  %1572 = vmatprep.subr.mxu0 %v1467_v34  ;;  %1978 = vmatprep.subr.mxu1 %v1467_v34  ;;  %v1166_v17 = vmul.f32 %v2164_v6, %v3073_v28 }
 0x176   : > { %1573 = vmatpush1.msra.mxu0 %v1466_v52  ;;  %2010 = vmatpush1.msra.mxu1 %v1466_v52  ;;  %v1167_v23 = vmul.f32 %v2165_v7, %v3073_v28  ;;  %v2168_v28 = vld [vmem:[%s3505_s0 + $0x50] sm:$0xff] }
 0x177   : > { %v1464_v38 = vmax.f32 %v1400_v30, 0.0  ;;  %v1465_v39 = vmax.f32 %v1401_v29, 0.0  ;;  %v2169_v30 = vld [vmem:[%s3505_s0 + $0x58] sm:$0xff] }
 0x178   : > { %v3081_v40 = vpop.permute.xlu0 %1024  ;;  %v1274_v20 = vpop.permute.xlu1 %1273 }
 0x179   : > { %v1398_v47 = vadd.f32 %v1274_v20, %v1174_v13  ;;  %v1399_v11 = vadd.f32 %v1274_v20, %v1175_v37  ;;  %1574 = vmatprep.subr.mxu0 %v1465_v39  ;;  %1979 = vmatprep.subr.mxu1 %v1465_v39  ;;  %v1164_v27 = vmul.f32 %v2166_v9, %v3081_v40 }
 0x17a   : > { %1575 = vmatpush1.msra.mxu0 %v1464_v38  ;;  %2011 = vmatpush1.msra.mxu1 %v1464_v38  ;;  %v1165_v10 = vmul.f32 %v2167_v25, %v3081_v40  ;;  %v2170_v40 = vld [vmem:[%s3505_s0 + $0x40] sm:$0xff] }
 0x17b   : > { %v1462_v53 = vmax.f32 %v1398_v47, 0.0  ;;  %v1463_v46 = vmax.f32 %v1399_v11, 0.0  ;;  %v2171_v47 = vld [vmem:[%s3505_s0 + $0x48] sm:$0xff] }
 0x17c   : > { %v3091_v45 = vpop.permute.xlu0 %1019  ;;  %v1269_v61 = vpop.permute.xlu1 %1268 }
 0x17d   : > { %v1396_v51 = vadd.f32 %v1269_v61, %v1172_v54  ;;  %v1397_v42 = vadd.f32 %v1269_v61, %v1173_v36  ;;  %1576 = vmatprep.subr.mxu0 %v1463_v46  ;;  %1980 = vmatprep.subr.mxu1 %v1463_v46  ;;  %v1162_v24 = vmul.f32 %v2168_v28, %v3091_v45 }
 0x17e   : > { %1577 = vmatpush1.msra.mxu0 %v1462_v53  ;;  %2012 = vmatpush1.msra.mxu1 %v1462_v53  ;;  %v1163_v29 = vmul.f32 %v2169_v30, %v3091_v45  ;;  %v2172_v45 = vld [vmem:[%s3505_s0 + $0x30] sm:$0xff] }
 0x17f   : > { %v1460_v49 = vmax.f32 %v1396_v51, 0.0  ;;  %v1461_v50 = vmax.f32 %v1397_v42, 0.0  ;;  %v2173_v51 = vld [vmem:[%s3505_s0 + $0x38] sm:$0xff] }
 0x180   : > { %v3101_v63 = vpop.permute.xlu0 %1014  ;;  %v1264_v19 = vpop.permute.xlu1 %1263 }
 0x181   : > { %v1394_v0 = vadd.f32 %v1264_v19, %v1170_v44  ;;  %v1395_v62 = vadd.f32 %v1264_v19, %v1171_v8  ;;  %1578 = vmatprep.subr.mxu0 %v1461_v50  ;;  %1981 = vmatprep.subr.mxu1 %v1461_v50  ;;  %v1160_v20 = vmul.f32 %v2170_v40, %v3101_v63 }
 0x182   : > { %1579 = vmatpush1.msra.mxu0 %v1460_v49  ;;  %2013 = vmatpush1.msra.mxu1 %v1460_v49  ;;  %v1161_v11 = vmul.f32 %v2171_v47, %v3101_v63  ;;  %v2174_v63 = vld [vmem:[%s3505_s0 + $0x20] sm:$0xff] }
 0x183   : > { %v1458_v33 = vmax.f32 %v1394_v0, 0.0  ;;  %v1459_v2 = vmax.f32 %v1395_v62, 0.0  ;;  %v2175_v0 = vld [vmem:[%s3505_s0 + $0x28] sm:$0xff] }
 0x184   : > { %v3111_v3 = vpop.permute.xlu0 %1009  ;;  %v1259_v57 = vpop.permute.xlu1 %1258 }
 0x185   : > { %v1392_v60 = vadd.f32 %v1259_v57, %v1168_v59  ;;  %v1393_v5 = vadd.f32 %v1259_v57, %v1169_v4  ;;  %1580 = vmatprep.subr.mxu0 %v1459_v2  ;;  %1982 = vmatprep.subr.mxu1 %v1459_v2  ;;  %v1158_v61 = vmul.f32 %v2172_v45, %v3111_v3 }
 0x186   : > { %1581 = vmatpush1.msra.mxu0 %v1458_v33  ;;  %2014 = vmatpush1.msra.mxu1 %v1458_v33  ;;  %v1159_v42 = vmul.f32 %v2173_v51, %v3111_v3  ;;  %v2176_v3 = vld [vmem:[%s3505_s0 + $0x10] sm:$0xff] }
 0x187   : > { %v1456_v22 = vmax.f32 %v1392_v60, 0.0  ;;  %v1457_v21 = vmax.f32 %v1393_v5, 0.0  ;;  %v2177_v60 = vld [vmem:[%s3505_s0 + $0x18] sm:$0xff] }
 0x188   : > { %v3121_v16 = vpop.permute.xlu0 %1004  ;;  %v1254_v14 = vpop.permute.xlu1 %1253 }
 0x189   : > { %v1390_v12 = vadd.f32 %v1254_v14, %v1166_v17  ;;  %v1391_v43 = vadd.f32 %v1254_v14, %v1167_v23  ;;  %1582 = vmatprep.subr.mxu0 %v1457_v21  ;;  %1983 = vmatprep.subr.mxu1 %v1457_v21  ;;  %v1156_v19 = vmul.f32 %v2174_v63, %v3121_v16 }
 0x18a   : > { %1583 = vmatpush1.msra.mxu0 %v1456_v22  ;;  %2015 = vmatpush1.msra.mxu1 %v1456_v22  ;;  %v1157_v62 = vmul.f32 %v2175_v0, %v3121_v16  ;;  %v2178_v16 = vld [vmem:[%s3505_s0] sm:$0xff] }
 0x18b   : > { %v1454_v15 = vmax.f32 %v1390_v12, 0.0  ;;  %v1455_v18 = vmax.f32 %v1391_v43, 0.0  ;;  %v2179_v12 = vld [vmem:[%s3505_s0 + $0x8] sm:$0xff] }
 0x18c   : > { %v3131_v31 = vpop.permute.xlu0 %999  ;;  %v1249_v32 = vpop.permute.xlu1 %1248 }
 0x18d   : > { %v1388_v52 = vadd.f32 %v1249_v32, %v1164_v27  ;;  %v1389_v34 = vadd.f32 %v1249_v32, %v1165_v10  ;;  %1584 = vmatprep.subr.mxu0 %v1455_v18  ;;  %1984 = vmatprep.subr.mxu1 %v1455_v18  ;;  %v1154_v57 = vmul.f32 %v2176_v3, %v3131_v31 }
 0x18e   : > { %1585 = vmatpush1.msra.mxu0 %v1454_v15  ;;  %2016 = vmatpush1.msra.mxu1 %v1454_v15  ;;  %v1155_v5 = vmul.f32 %v2177_v60, %v3131_v31  ;;  %v2180_v31 = vld [vmem:[%s3505_s0 + $0x1f0] sm:$0xff] }
 0x18f   : > { %v1452_v1 = vmax.f32 %v1388_v52, 0.0  ;;  %v1453_v13 = vmax.f32 %v1389_v34, 0.0  ;;  %v2181_v52 = vld [vmem:[%s3505_s0 + $0x1f8] sm:$0xff] }
 0x190   : > { %v3141_v48 = vpop.permute.xlu0 %994  ;;  %v1244_v37 = vpop.permute.xlu1 %1243 }
 0x191   : > { %v1386_v38 = vadd.f32 %v1244_v37, %v1162_v24  ;;  %v1387_v39 = vadd.f32 %v1244_v37, %v1163_v29  ;;  %1586 = vmatprep.subr.mxu0 %v1453_v13  ;;  %1985 = vmatprep.subr.mxu1 %v1453_v13  ;;  %v1152_v14 = vmul.f32 %v2178_v16, %v3141_v48 }
 0x192   : > { %1587 = vmatpush1.msra.mxu0 %v1452_v1  ;;  %2017 = vmatpush1.msra.mxu1 %v1452_v1  ;;  %v1153_v43 = vmul.f32 %v2179_v12, %v3141_v48  ;;  %v2182_v48 = vld [vmem:[%s3505_s0 + $0x1e0] sm:$0xff] }
 0x193   : > { %v1450_v26 = vmax.f32 %v1386_v38, 0.0  ;;  %v1451_v54 = vmax.f32 %v1387_v39, 0.0  ;;  %v2183_v38 = vld [vmem:[%s3505_s0 + $0x1e8] sm:$0xff] }
 0x194   : > { %v3151_v35 = vpop.permute.xlu0 %1149  ;;  %v1239_v36 = vpop.permute.xlu1 %1238 }
 0x195   : > { %v1384_v53 = vadd.f32 %v1239_v36, %v1160_v20  ;;  %v1385_v46 = vadd.f32 %v1239_v36, %v1161_v11  ;;  %1588 = vmatprep.subr.mxu0 %v1451_v54  ;;  %1986 = vmatprep.subr.mxu1 %v1451_v54  ;;  %v1214_v32 = vmul.f32 %v2180_v31, %v3151_v35 }
 0x196   : > { %1589 = vmatpush1.msra.mxu0 %v1450_v26  ;;  %2018 = vmatpush1.msra.mxu1 %v1450_v26  ;;  %v1215_v34 = vmul.f32 %v2181_v52, %v3151_v35  ;;  %v2184_v35 = vld [vmem:[%s3505_s0 + $0x1d0] sm:$0xff] }
 0x197   : > { %v1448_v55 = vmax.f32 %v1384_v53, 0.0  ;;  %v1449_v44 = vmax.f32 %v1385_v46, 0.0  ;;  %v2185_v53 = vld [vmem:[%s3505_s0 + $0x1d8] sm:$0xff] }
 0x198   : > { %v3161_v41 = vpop.permute.xlu0 %1144  ;;  %v1234_v8 = vpop.permute.xlu1 %1233 }
 0x199   : > { %v1382_v49 = vadd.f32 %v1234_v8, %v1158_v61  ;;  %v1383_v50 = vadd.f32 %v1234_v8, %v1159_v42  ;;  %1590 = vmatprep.subr.mxu0 %v1449_v44  ;;  %1987 = vmatprep.subr.mxu1 %v1449_v44  ;;  %v1212_v37 = vmul.f32 %v2182_v48, %v3161_v41 }
 0x19a   : > { %1591 = vmatpush1.msra.mxu0 %v1448_v55  ;;  %2019 = vmatpush1.msra.mxu1 %v1448_v55  ;;  %v1213_v39 = vmul.f32 %v2183_v38, %v3161_v41  ;;  %v2186_v41 = vld [vmem:[%s3505_s0 + $0x1c0] sm:$0xff] }
 0x19b   : > { %v1446_v56 = vmax.f32 %v1382_v49, 0.0  ;;  %v1447_v59 = vmax.f32 %v1383_v50, 0.0  ;;  %v2187_v49 = vld [vmem:[%s3505_s0 + $0x1c8] sm:$0xff] }
 0x19c   : > { %v3171_v58 = vpop.permute.xlu0 %1139  ;;  %v1229_v4 = vpop.permute.xlu1 %1228 }
 0x19d   : > { %v1380_v33 = vadd.f32 %v1229_v4, %v1156_v19  ;;  %v1381_v2 = vadd.f32 %v1229_v4, %v1157_v62  ;;  %1592 = vmatprep.subr.mxu0 %v1447_v59  ;;  %1988 = vmatprep.subr.mxu1 %v1447_v59  ;;  %v1210_v36 = vmul.f32 %v2184_v35, %v3171_v58 }
 0x19e   : > { %1593 = vmatpush1.msra.mxu0 %v1446_v56  ;;  %2020 = vmatpush1.msra.mxu1 %v1446_v56  ;;  %v1211_v46 = vmul.f32 %v2185_v53, %v3171_v58  ;;  %v2188_v58 = vld [vmem:[%s3505_s0 + $0x1b0] sm:$0xff] }
 0x19f   : > { %v1444_v6 = vmax.f32 %v1380_v33, 0.0  ;;  %v1445_v17 = vmax.f32 %v1381_v2, 0.0  ;;  %v2189_v33 = vld [vmem:[%s3505_s0 + $0x1b8] sm:$0xff] }
 0x1a0   : > { %v3181_v7 = vpop.permute.xlu0 %1134  ;;  %v1224_v23 = vpop.permute.xlu1 %1223 }
 0x1a1   : > { %v1378_v22 = vadd.f32 %v1224_v23, %v1154_v57  ;;  %v1379_v21 = vadd.f32 %v1224_v23, %v1155_v5  ;;  %1594 = vmatprep.subr.mxu0 %v1445_v17  ;;  %1989 = vmatprep.subr.mxu1 %v1445_v17  ;;  %v1208_v8 = vmul.f32 %v2186_v41, %v3181_v7 }
 0x1a2   : > { %1595 = vmatpush1.msra.mxu0 %v1444_v6  ;;  %2021 = vmatpush1.msra.mxu1 %v1444_v6  ;;  %v1209_v50 = vmul.f32 %v2187_v49, %v3181_v7  ;;  %v2190_v7 = vld [vmem:[%s3505_s0 + $0x1a0] sm:$0xff] }
 0x1a3   : > { %v1442_v9 = vmax.f32 %v1378_v22, 0.0  ;;  %v1443_v27 = vmax.f32 %v1379_v21, 0.0  ;;  %v2191_v22 = vld [vmem:[%s3505_s0 + $0x1a8] sm:$0xff] }
 0x1a4   : > { %v3191_v25 = vpop.permute.xlu0 %1129  ;;  %v1219_v10 = vpop.permute.xlu1 %1218 }
 0x1a5   : > { %v1376_v15 = vadd.f32 %v1219_v10, %v1152_v14  ;;  %v1377_v18 = vadd.f32 %v1219_v10, %v1153_v43  ;;  %1596 = vmatprep.subr.mxu0 %v1443_v27  ;;  %1990 = vmatprep.subr.mxu1 %v1443_v27  ;;  %v1206_v4 = vmul.f32 %v2188_v58, %v3191_v25 }
 0x1a6   : > { %1597 = vmatpush1.msra.mxu0 %v1442_v9  ;;  %2022 = vmatpush1.msra.mxu1 %v1442_v9  ;;  %v1207_v2 = vmul.f32 %v2189_v33, %v3191_v25  ;;  %v2192_v25 = vld [vmem:[%s3505_s0 + $0x190] sm:$0xff] }
 0x1a7   : > { %v1440_v28 = vmax.f32 %v1376_v15, 0.0  ;;  %v1441_v24 = vmax.f32 %v1377_v18, 0.0  ;;  %v2193_v15 = vld [vmem:[%s3505_s0 + $0x198] sm:$0xff] }
 0x1a8   : > { %v3201_v30 = vpop.permute.xlu0 %1124  ;;  %v1374_v29 = vpop.permute.xlu1 %1373 }
 0x1a9   : > { %v1438_v1 = vadd.f32 %v1374_v29, %v1214_v32  ;;  %v1439_v13 = vadd.f32 %v1374_v29, %v1215_v34  ;;  %1598 = vmatprep.subr.mxu0 %v1441_v24  ;;  %1991 = vmatprep.subr.mxu1 %v1441_v24  ;;  %v1204_v23 = vmul.f32 %v2190_v7, %v3201_v30 }
 0x1aa   : > { %1599 = vmatpush1.msra.mxu0 %v1440_v28  ;;  %2023 = vmatpush1.msra.mxu1 %v1440_v28  ;;  %v1205_v21 = vmul.f32 %v2191_v22, %v3201_v30  ;;  %v2194_v30 = vld [vmem:[%s3505_s0 + $0x180] sm:$0xff] }
 0x1ab   : > { %v1502_v40 = vmax.f32 %v1438_v1, 0.0  ;;  %v1503_v20 = vmax.f32 %v1439_v13, 0.0  ;;  %v2195_v1 = vld [vmem:[%s3505_s0 + $0x188] sm:$0xff] }
 0x1ac   : > { %v3211_v47 = vpop.permute.xlu0 %1119  ;;  %v1369_v11 = vpop.permute.xlu1 %1368 }
 0x1ad   : > { %v1436_v26 = vadd.f32 %v1369_v11, %v1212_v37  ;;  %v1437_v54 = vadd.f32 %v1369_v11, %v1213_v39  ;;  %1600 = vmatprep.subr.mxu0 %v1503_v20  ;;  %1992 = vmatprep.subr.mxu1 %v1503_v20  ;;  %v1202_v10 = vmul.f32 %v2192_v25, %v3211_v47 }
 0x1ae   : > { %1601 = vmatpush2.msra.mxu0 %v1502_v40  ;;  %2024 = vmatpush2.msra.mxu1 %v1502_v40  ;;  %v1203_v18 = vmul.f32 %v2193_v15, %v3211_v47  ;;  %v2196_v47 = vld [vmem:[%s3505_s0 + $0x170] sm:$0xff] }
 0x1af   : > { %v1500_v45 = vmax.f32 %v1436_v26, 0.0  ;;  %v1501_v61 = vmax.f32 %v1437_v54, 0.0  ;;  %v2197_v26 = vld [vmem:[%s3505_s0 + $0x178] sm:$0xff] }
 0x1b0   : > { %v3221_v51 = vpop.permute.xlu0 %1114  ;;  %v1364_v42 = vpop.permute.xlu1 %1363 }
 0x1b1   : > { %v1434_v55 = vadd.f32 %v1364_v42, %v1210_v36  ;;  %v1435_v44 = vadd.f32 %v1364_v42, %v1211_v46  ;;  %1602 = vmatprep.subr.mxu0 %v1501_v61  ;;  %1993 = vmatprep.subr.mxu1 %v1501_v61  ;;  %v1200_v29 = vmul.f32 %v2194_v30, %v3221_v51  ;;  %v2198_v61 = vld [vmem:[%s3505_s0 + $0x160] sm:$0xff]  ;;  %v2199_v42 = vld [vmem:[%s3505_s0 + $0x168] sm:$0xff] }
 0x1b2   : > { %1603 = vmatpush2.msra.mxu0 %v1500_v45  ;;  %2025 = vmatpush2.msra.mxu1 %v1500_v45  ;;  %v1201_v13 = vmul.f32 %v2195_v1, %v3221_v51 }
 0x1b3   : > { %v1498_v63 = vmax.f32 %v1434_v55, 0.0  ;;  %v1499_v19 = vmax.f32 %v1435_v44, 0.0 }
 0x1b4   : > { %v3231_v0 = vpop.permute.xlu0 %1109  ;;  %v1359_v62 = vpop.permute.xlu1 %1358 }
 0x1b5   : > { %v1432_v56 = vadd.f32 %v1359_v62, %v1208_v8  ;;  %v1433_v59 = vadd.f32 %v1359_v62, %v1209_v50  ;;  %1604 = vmatprep.subr.mxu0 %v1499_v19  ;;  %1994 = vmatprep.subr.mxu1 %v1499_v19  ;;  %v1198_v11 = vmul.f32 %v2196_v47, %v3231_v0  ;;  %v2200_v19 = vld [vmem:[%s3505_s0 + $0x150] sm:$0xff]  ;;  %v2201_v62 = vld [vmem:[%s3505_s0 + $0x158] sm:$0xff] }
 0x1b6   : > { %1605 = vmatpush2.msra.mxu0 %v1498_v63  ;;  %2026 = vmatpush2.msra.mxu1 %v1498_v63  ;;  %v1199_v54 = vmul.f32 %v2197_v26, %v3231_v0  ;;  %v2211_v26 = vld [vmem:[%s3505_s0 + $0x100] sm:$0xff] }
 0x1b7   : > { %v1496_v3 = vmax.f32 %v1432_v56, 0.0  ;;  %v1497_v57 = vmax.f32 %v1433_v59, 0.0 }
 0x1b8   : > { %v3241_v60 = vpop.permute.xlu0 %1104  ;;  %v1354_v5 = vpop.permute.xlu1 %1353 }
 0x1b9   : > { %v1430_v6 = vadd.f32 %v1354_v5, %v1206_v4  ;;  %v1431_v17 = vadd.f32 %v1354_v5, %v1207_v2  ;;  %1606 = vmatprep.subr.mxu0 %v1497_v57  ;;  %1995 = vmatprep.subr.mxu1 %v1497_v57  ;;  %v1196_v51 = vmul.f32 %v2198_v61, %v3241_v60  ;;  %v2202_v57 = vld [vmem:[%s3505_s0 + $0x140] sm:$0xff]  ;;  %v2203_v5 = vld [vmem:[%s3505_s0 + $0x148] sm:$0xff] }
 0x1ba   : > { %1607 = vmatpush2.msra.mxu0 %v1496_v3  ;;  %2027 = vmatpush2.msra.mxu1 %v1496_v3  ;;  %v1197_v55 = vmul.f32 %v2199_v42, %v3241_v60 }
 0x1bb   : > { %v1494_v16 = vmax.f32 %v1430_v6, 0.0  ;;  %v1495_v14 = vmax.f32 %v1431_v17, 0.0 }
 0x1bc   : > { %v3251_v12 = vpop.permute.xlu0 %1099  ;;  %v1349_v43 = vpop.permute.xlu1 %1348 }
 0x1bd   : > { %v1428_v9 = vadd.f32 %v1349_v43, %v1204_v23  ;;  %v1429_v27 = vadd.f32 %v1349_v43, %v1205_v21  ;;  %1608 = vmatprep.subr.mxu0 %v1495_v14  ;;  %1996 = vmatprep.subr.mxu1 %v1495_v14  ;;  %v1194_v0 = vmul.f32 %v2200_v19, %v3251_v12  ;;  %v1509_v19 = vld [vmem:[%s2383_s9 + $0x28] sm:$0xff] }
 0x1be   : > { %1609 = vmatpush2.msra.mxu0 %v1494_v16  ;;  %2028 = vmatpush2.msra.mxu1 %v1494_v16  ;;  %v1195_v56 = vmul.f32 %v2201_v62, %v3251_v12  ;;  %v2204_v16 = vld [vmem:[%s3505_s0 + $0x130] sm:$0xff]  ;;  %v2205_v12 = vld [vmem:[%s3505_s0 + $0x138] sm:$0xff]  ;;  %v1508_v62 = vld [vmem:[%s2383_s9 + $0x20] sm:$0xff] }
 0x1bf   : > { %v1492_v31 = vmax.f32 %v1428_v9, 0.0  ;;  %v1493_v32 = vmax.f32 %v1429_v27, 0.0 }
 0x1c0   : > { %v3261_v52 = vpop.permute.xlu0 %1094  ;;  %v1344_v34 = vpop.permute.xlu1 %1343 }
 0x1c1   : > { %v1426_v28 = vadd.f32 %v1344_v34, %v1202_v10  ;;  %v1427_v24 = vadd.f32 %v1344_v34, %v1203_v18  ;;  %1610 = vmatprep.subr.mxu0 %v1493_v32  ;;  %1997 = vmatprep.subr.mxu1 %v1493_v32  ;;  %v1192_v60 = vmul.f32 %v2202_v57, %v3261_v52  ;;  %v1512_v57 = vld [vmem:[%s2383_s9 + $0x40] sm:$0xff] }
 0x1c2   : > { %1611 = vmatpush2.msra.mxu0 %v1492_v31  ;;  %2029 = vmatpush2.msra.mxu1 %v1492_v31  ;;  %v1193_v6 = vmul.f32 %v2203_v5, %v3261_v52  ;;  %v2206_v31 = vld [vmem:[%s3505_s0 + $0x120] sm:$0xff]  ;;  %v2207_v52 = vld [vmem:[%s3505_s0 + $0x128] sm:$0xff]  ;;  %v1515_v5 = vld [vmem:[%s2383_s9 + $0x58] sm:$0xff] }
 0x1c3   : > { %v1490_v48 = vmax.f32 %v1426_v28, 0.0  ;;  %v1491_v37 = vmax.f32 %v1427_v24, 0.0 }
 0x1c4   : > { %v1339_v38 = vpop.permute.xlu1 %1338  ;;  %v1090_v20 = vpop.permute.xlu0 %1089 }
 0x1c5   : > { %v1424_v39 = vadd.f32 %v1339_v38, %v1200_v29  ;;  %v1425_v40 = vadd.f32 %v1339_v38, %v1201_v13  ;;  %1612 = vmatprep.subr.mxu0 %v1491_v37  ;;  %1998 = vmatprep.subr.mxu1 %v1491_v37  ;;  %v1190_v14 = vmul.f32 %v2204_v16, %v1090_v20  ;;  %v2208_v13 = vld [vmem:[%s3505_s0 + $0x110] sm:$0xff]  ;;  %v2209_v38 = vld [vmem:[%s3505_s0 + $0x118] sm:$0xff]  ;;  %v1548_v16 = vld [vmem:[%s2383_s9 + $0x160] sm:$0xff] }
 0x1c6   : > { %1613 = vmatpush2.msra.mxu0 %v1490_v48  ;;  %2030 = vmatpush2.msra.mxu1 %v1490_v48  ;;  %v1191_v43 = vmul.f32 %v2205_v12, %v1090_v20  ;;  %v1551_v12 = vld [vmem:[%s2383_s9 + $0x178] sm:$0xff] }
 0x1c7   : > { %v1488_v35 = vmax.f32 %v1424_v39, 0.0  ;;  %v1489_v36 = vmax.f32 %v1425_v40, 0.0  ;;  %v2210_v40 = vld [vmem:[%s3505_s0 + $0x108] sm:$0xff] }
 0x1c8   : > { %v1334_v53 = vpop.permute.xlu1 %1333  ;;  %v1085_v8 = vpop.permute.xlu0 %1084 }
 0x1c9   : > { %v1422_v46 = vadd.f32 %v1334_v53, %v1198_v11  ;;  %v1423_v45 = vadd.f32 %v1334_v53, %v1199_v54  ;;  %1614 = vmatprep.subr.mxu0 %v1489_v36  ;;  %1999 = vmatprep.subr.mxu1 %v1489_v36  ;;  %v1188_v32 = vmul.f32 %v2206_v31, %v1085_v8  ;;  %v1555_v31 = vld [vmem:[%s2383_s9 + $0x198] sm:$0xff] }
 0x1ca   : > { %1615 = vmatpush2.msra.mxu0 %v1488_v35  ;;  %2031 = vmatpush2.msra.mxu1 %v1488_v35  ;;  %v1189_v34 = vmul.f32 %v2207_v52, %v1085_v8  ;;  %v1507_v8 = vld [vmem:[%s2383_s9 + $0x18] sm:$0xff]  ;;  %v1554_v52 = vld [vmem:[%s2383_s9 + $0x190] sm:$0xff] }
 0x1cb   : > { %v1486_v44 = vmax.f32 %v1422_v46, 0.0  ;;  %v1487_v41 = vmax.f32 %v1423_v45, 0.0 }
 0x1cc   : > { %v1329_v49 = vpop.permute.xlu1 %1328  ;;  %v1080_v3 = vpop.permute.xlu0 %1079 }
 0x1cd   : > { %v1420_v50 = vadd.f32 %v1329_v49, %v1196_v51  ;;  %v1421_v63 = vadd.f32 %v1329_v49, %v1197_v55  ;;  %1616 = vmatprep.subr.mxu0 %v1487_v41  ;;  %2000 = vmatprep.subr.mxu1 %v1487_v41  ;;  %v1186_v48 = vmul.f32 %v2208_v13, %v1080_v3  ;;  %v1536_v41 = vld [vmem:[%s2383_s9 + $0x100] sm:$0xff]  ;;  %v1539_v49 = vld [vmem:[%s2383_s9 + $0x118] sm:$0xff]  ;;  %v1526_v13 = vld [vmem:[%s2383_s9 + $0xb0] sm:$0xff] }
 0x1ce   : > { %1617 = vmatpush2.msra.mxu0 %v1486_v44  ;;  %2032 = vmatpush2.msra.mxu1 %v1486_v44  ;;  %v1187_v39 = vmul.f32 %v2209_v38, %v1080_v3  ;;  %v1504_v44 = vld [vmem:[%s2383_s9] sm:$0xff]  ;;  %v1545_v3 = vld [vmem:[%s2383_s9 + $0x148] sm:$0xff] }
 0x1cf   : > { %v1484_v59 = vmax.f32 %v1420_v50, 0.0  ;;  %v1485_v58 = vmax.f32 %v1421_v63, 0.0  ;;  %v1506_v50 = vld [vmem:[%s2383_s9 + $0x10] sm:$0xff]  ;;  %v1561_v38 = vld [vmem:[%s2383_s9 + $0x1c8] sm:$0xff] }
 0x1d0   : > { %v1324_v4 = vpop.permute.xlu1 %1323  ;;  %v1075_v25 = vpop.permute.xlu0 %1074  ;;  %v1538_v63 = vld [vmem:[%s2383_s9 + $0x110] sm:$0xff] }
 0x1d1   : > { %v1418_v33 = vadd.f32 %v1324_v4, %v1194_v0  ;;  %v1419_v2 = vadd.f32 %v1324_v4, %v1195_v56  ;;  %1618 = vmatprep.subr.mxu0 %v1485_v58  ;;  %2001 = vmatprep.subr.mxu1 %v1485_v58  ;;  %v1185_v20 = vmul.f32 %v2210_v40, %v1075_v25  ;;  %v1541_v0 = vld [vmem:[%s2383_s9 + $0x128] sm:$0xff]  ;;  %v1540_v56 = vld [vmem:[%s2383_s9 + $0x120] sm:$0xff]  ;;  %v1543_v58 = vld [vmem:[%s2383_s9 + $0x138] sm:$0xff] }
 0x1d2   : > { %1619 = vmatpush2.msra.mxu0 %v1484_v59  ;;  %2033 = vmatpush2.msra.mxu1 %v1484_v59  ;;  %v1184_v54 = vmul.f32 %v2211_v26, %v1075_v25  ;;  %v1511_v59 = vld [vmem:[%s2383_s9 + $0x38] sm:$0xff]  ;;  %v1510_v4 = vld [vmem:[%s2383_s9 + $0x30] sm:$0xff]  ;;  %v1553_v25 = vld [vmem:[%s2383_s9 + $0x188] sm:$0xff] }
 0x1d3   : > { %v1482_v17 = vmax.f32 %v1418_v33, 0.0  ;;  %v1483_v7 = vmax.f32 %v1419_v2, 0.0  ;;  %v1542_v33 = vld [vmem:[%s2383_s9 + $0x130] sm:$0xff]  ;;  %v1513_v2 = vld [vmem:[%s2383_s9 + $0x48] sm:$0xff]  ;;  %v1560_v40 = vld [vmem:[%s2383_s9 + $0x1c0] sm:$0xff] }
 0x1d4   : > { %v1319_v23 = vpop.permute.xlu1 %1318  ;;  %v1299_v37 = vpop.permute.xlu0 %1298  ;;  %v1562_v26 = vld [vmem:[%s2383_s9 + $0x1d0] sm:$0xff] }
 0x1d5   : > { %v1416_v22 = vadd.f32 %v1319_v23, %v1192_v60  ;;  %v1417_v21 = vadd.f32 %v1319_v23, %v1193_v6  ;;  %1620 = vmatprep.subr.mxu0 %v1483_v7  ;;  %2002 = vmatprep.subr.mxu1 %v1483_v7  ;;  %v1409_v36 = vadd.f32 %v1299_v37, %v1185_v20  ;;  %v1544_v60 = vld [vmem:[%s2383_s9 + $0x140] sm:$0xff]  ;;  %v1547_v6 = vld [vmem:[%s2383_s9 + $0x158] sm:$0xff]  ;;  %v1546_v7 = vld [vmem:[%s2383_s9 + $0x150] sm:$0xff] }
 0x1d6   : > { %1621 = vmatpush2.msra.mxu0 %v1482_v17  ;;  %2034 = vmatpush2.msra.mxu1 %v1482_v17  ;;  %v1408_v45 = vadd.f32 %v1299_v37, %v1184_v54  ;;  %v1514_v17 = vld [vmem:[%s2383_s9 + $0x50] sm:$0xff]  ;;  %v1517_v23 = vld [vmem:[%s2383_s9 + $0x68] sm:$0xff]  ;;  %v1531_v20 = vld [vmem:[%s2383_s9 + $0xd8] sm:$0xff] }
 0x1d7   : > { %v1480_v9 = vmax.f32 %v1416_v22, 0.0  ;;  %v1481_v27 = vmax.f32 %v1417_v21, 0.0  ;;  %v1473_v42 = vmax.f32 %v1409_v36, 0.0  ;;  %v1549_v22 = vld [vmem:[%s2383_s9 + $0x168] sm:$0xff]  ;;  %v1516_v21 = vld [vmem:[%s2383_s9 + $0x60] sm:$0xff] }
 0x1d8   : > { %v1314_v10 = vpop.permute.xlu1 %1313  ;;  %v1472_v55 = vmax.f32 %v1408_v45, 0.0  ;;  %v1529_v37 = vld [vmem:[%s2383_s9 + $0xc8] sm:$0xff]  ;;  %v1532_v36 = vld [vmem:[%s2383_s9 + $0xe0] sm:$0xff]  ;;  %v1567_v45 = vld [vmem:[%s2383_s9 + $0x1f8] sm:$0xff] }
 0x1d9   : > { %v1414_v15 = vadd.f32 %v1314_v10, %v1190_v14  ;;  %v1415_v18 = vadd.f32 %v1314_v10, %v1191_v43  ;;  %1622 = vmatprep.subr.mxu0 %v1481_v27  ;;  %2003 = vmatprep.subr.mxu1 %v1481_v27  ;;  %v1519_v14 = vld [vmem:[%s2383_s9 + $0x78] sm:$0xff]  ;;  %v1518_v43 = vld [vmem:[%s2383_s9 + $0x70] sm:$0xff]  ;;  %v1521_v27 = vld [vmem:[%s2383_s9 + $0x88] sm:$0xff] }
 0x1da   : > { %1623 = vmatpush2.msra.mxu0 %v1480_v9  ;;  %2035 = vmatpush2.msra.mxu1 %v1480_v9  ;;  %v1550_v9 = vld [vmem:[%s2383_s9 + $0x170] sm:$0xff]  ;;  %v1520_v10 = vld [vmem:[%s2383_s9 + $0x80] sm:$0xff]  ;;  %v1533_v54 = vld [vmem:[%s2383_s9 + $0xe8] sm:$0xff] }
 0x1db   : > { %v1478_v28 = vmax.f32 %v1414_v15, 0.0  ;;  %v1479_v24 = vmax.f32 %v1415_v18, 0.0  ;;  %v1552_v15 = vld [vmem:[%s2383_s9 + $0x180] sm:$0xff]  ;;  %v1523_v18 = vld [vmem:[%s2383_s9 + $0x98] sm:$0xff] }
 0x1dc   : > { %v1309_v30 = vpop.permute.xlu1 %1308 }
 0x1dd   : > { %v1412_v29 = vadd.f32 %v1309_v30, %v1188_v32  ;;  %v1413_v1 = vadd.f32 %v1309_v30, %v1189_v34  ;;  %1624 = vmatprep.subr.mxu0 %v1479_v24  ;;  %2004 = vmatprep.subr.mxu1 %v1479_v24  ;;  %v1522_v32 = vld [vmem:[%s2383_s9 + $0x90] sm:$0xff]  ;;  %v1525_v34 = vld [vmem:[%s2383_s9 + $0xa8] sm:$0xff]  ;;  %v1524_v24 = vld [vmem:[%s2383_s9 + $0xa0] sm:$0xff] }
 0x1de   : > { %1625 = vmatpush2.msra.mxu0 %v1478_v28  ;;  %2036 = vmatpush2.msra.mxu1 %v1478_v28  ;;  %v1557_v28 = vld [vmem:[%s2383_s9 + $0x1a8] sm:$0xff]  ;;  %v1556_v30 = vld [vmem:[%s2383_s9 + $0x1a0] sm:$0xff] }
 0x1df   : > { %v1476_v47 = vmax.f32 %v1412_v29, 0.0  ;;  %v1477_v11 = vmax.f32 %v1413_v1, 0.0  ;;  %v1527_v29 = vld [vmem:[%s2383_s9 + $0xb8] sm:$0xff] }
 0x1e0   : > { %v1304_v35 = vpop.permute.xlu1 %1303  ;;  %v1559_v1 = vld [vmem:[%s2383_s9 + $0x1b8] sm:$0xff] }
 0x1e1   : > { %v1410_v53 = vadd.f32 %v1304_v35, %v1186_v48  ;;  %v1411_v46 = vadd.f32 %v1304_v35, %v1187_v39  ;;  %1626 = vmatprep.subr.mxu0 %v1477_v11  ;;  %2005 = vmatprep.subr.mxu1 %v1477_v11  ;;  %v1558_v48 = vld [vmem:[%s2383_s9 + $0x1b0] sm:$0xff]  ;;  %v1528_v39 = vld [vmem:[%s2383_s9 + $0xc0] sm:$0xff]  ;;  %v1565_v35 = vld [vmem:[%s2383_s9 + $0x1e8] sm:$0xff] }
 0x1e2   : > { %1627 = vmatpush2.msra.mxu0 %v1476_v47  ;;  %2037 = vmatpush2.msra.mxu1 %v1476_v47  ;;  %v1563_v47 = vld [vmem:[%s2383_s9 + $0x1d8] sm:$0xff]  ;;  %v1530_v11 = vld [vmem:[%s2383_s9 + $0xd0] sm:$0xff] }
 0x1e3   : > { %v1474_v61 = vmax.f32 %v1410_v53, 0.0  ;;  %v1475_v51 = vmax.f32 %v1411_v46, 0.0  ;;  %v1564_v53 = vld [vmem:[%s2383_s9 + $0x1e0] sm:$0xff]  ;;  %v1535_v46 = vld [vmem:[%s2383_s9 + $0xf8] sm:$0xff] }
 0x1e5   : > { %1628 = vmatprep.subr.mxu0 %v1475_v51  ;;  %2006 = vmatprep.subr.mxu1 %v1475_v51  ;;  %v1566_v51 = vld [vmem:[%s2383_s9 + $0x1f0] sm:$0xff] }
 0x1e6   : > { %1629 = vmatpush2.msra.mxu0 %v1474_v61  ;;  %2038 = vmatpush2.msra.mxu1 %v1474_v61  ;;  %v1534_v61 = vld [vmem:[%s2383_s9 + $0xf0] sm:$0xff] }
 0x1e7   : > { %1630 = vmatprep.subr.mxu0 %v1473_v42  ;;  %2007 = vmatprep.subr.mxu1 %v1473_v42 }
 0x1e8   : > { %1631 = vmatpush2.msra.mxu0 %v1472_v55  ;;  %2039 = vmatpush2.msra.mxu1 %v1472_v55 }
 0x1e9   : > { %1633 = vmatmul.mubr.f32.vlgmr.msra.gmra.mxu0 %v1504_v44  ;;  %1729 = vmatmul.mubr.f32.vlgmr.msra.gmra.mxu1 %v1536_v41 }
 0x1ea   : > { %1638 = vmatprep.mubr.f32.mxu0 %v1507_v8  ;;  %1734 = vmatprep.mubr.f32.mxu1 %v1539_v49 }
 0x1ed   : > { %1639 = vmatmul.mubr.f32.gmra.mxu0 %v1506_v50  ;;  %1735 = vmatmul.mubr.f32.gmra.mxu1 %v1538_v63 }
 0x1ee   : > { %1644 = vmatprep.mubr.f32.mxu0 %v1509_v19  ;;  %1740 = vmatprep.mubr.f32.mxu1 %v1541_v0 }
 0x1f1   : > { %1645 = vmatmul.mubr.f32.gmra.mxu0 %v1508_v62  ;;  %1741 = vmatmul.mubr.f32.gmra.mxu1 %v1540_v56 }
 0x1f2   : > { %1650 = vmatprep.mubr.f32.mxu0 %v1511_v59  ;;  %1746 = vmatprep.mubr.f32.mxu1 %v1543_v58 }
 0x1f5   : > { %1651 = vmatmul.mubr.f32.gmra.mxu0 %v1510_v4  ;;  %1747 = vmatmul.mubr.f32.gmra.mxu1 %v1542_v33 }
 0x1f6   : > { %1656 = vmatprep.mubr.f32.mxu0 %v1513_v2  ;;  %1752 = vmatprep.mubr.f32.mxu1 %v1545_v3 }
 0x1f9   : > { %1657 = vmatmul.mubr.f32.gmra.mxu0 %v1512_v57  ;;  %1753 = vmatmul.mubr.f32.gmra.mxu1 %v1544_v60 }
 0x1fa   : > { %1662 = vmatprep.mubr.f32.mxu0 %v1515_v5  ;;  %1758 = vmatprep.mubr.f32.mxu1 %v1547_v6 }
 0x1fd   : > { %1663 = vmatmul.mubr.f32.gmra.mxu0 %v1514_v17  ;;  %1759 = vmatmul.mubr.f32.gmra.mxu1 %v1546_v7 }
 0x1fe   : > { %1668 = vmatprep.mubr.f32.mxu0 %v1517_v23  ;;  %1764 = vmatprep.mubr.f32.mxu1 %v1549_v22 }
 0x201   : > { %1669 = vmatmul.mubr.f32.gmra.mxu0 %v1516_v21  ;;  %1765 = vmatmul.mubr.f32.gmra.mxu1 %v1548_v16 }
 0x202   : > { %1674 = vmatprep.mubr.f32.mxu0 %v1519_v14  ;;  %1770 = vmatprep.mubr.f32.mxu1 %v1551_v12 }
 0x205   : > { %1675 = vmatmul.mubr.f32.gmra.mxu0 %v1518_v43  ;;  %1771 = vmatmul.mubr.f32.gmra.mxu1 %v1550_v9 }
 0x206   : > { %1680 = vmatprep.mubr.f32.mxu0 %v1521_v27  ;;  %1776 = vmatprep.mubr.f32.mxu1 %v1553_v25 }
 0x209   : > { %1681 = vmatmul.mubr.f32.gmra.mxu0 %v1520_v10  ;;  %1777 = vmatmul.mubr.f32.gmra.mxu1 %v1552_v15 }
 0x20a   : > { %1686 = vmatprep.mubr.f32.mxu0 %v1523_v18  ;;  %1782 = vmatprep.mubr.f32.mxu1 %v1555_v31 }
 0x20d   : > { %1687 = vmatmul.mubr.f32.gmra.mxu0 %v1522_v32  ;;  %1783 = vmatmul.mubr.f32.gmra.mxu1 %v1554_v52 }
 0x20e   : > { %1692 = vmatprep.mubr.f32.mxu0 %v1525_v34  ;;  %1788 = vmatprep.mubr.f32.mxu1 %v1557_v28 }
 0x211   : > { %1693 = vmatmul.mubr.f32.gmra.mxu0 %v1524_v24  ;;  %1789 = vmatmul.mubr.f32.gmra.mxu1 %v1556_v30 }
 0x212   : > { %1698 = vmatprep.mubr.f32.mxu0 %v1527_v29  ;;  %1794 = vmatprep.mubr.f32.mxu1 %v1559_v1 }
 0x215   : > { %1699 = vmatmul.mubr.f32.gmra.mxu0 %v1526_v13  ;;  %1795 = vmatmul.mubr.f32.gmra.mxu1 %v1558_v48 }
 0x216   : > { %1704 = vmatprep.mubr.f32.mxu0 %v1529_v37  ;;  %1800 = vmatprep.mubr.f32.mxu1 %v1561_v38 }
 0x219   : > { %1705 = vmatmul.mubr.f32.gmra.mxu0 %v1528_v39  ;;  %1801 = vmatmul.mubr.f32.gmra.mxu1 %v1560_v40 }
 0x21a   : > { %1710 = vmatprep.mubr.f32.mxu0 %v1531_v20  ;;  %1806 = vmatprep.mubr.f32.mxu1 %v1563_v47 }
 0x21d   : > { %1711 = vmatmul.mubr.f32.gmra.mxu0 %v1530_v11  ;;  %1807 = vmatmul.mubr.f32.gmra.mxu1 %v1562_v26 }
 0x21e   : > { %1716 = vmatprep.mubr.f32.mxu0 %v1533_v54  ;;  %1812 = vmatprep.mubr.f32.mxu1 %v1565_v35 }
 0x221   : > { %1717 = vmatmul.mubr.f32.gmra.mxu0 %v1532_v36  ;;  %1813 = vmatmul.mubr.f32.gmra.mxu1 %v1564_v53 }
 0x222   : > { %1722 = vmatprep.mubr.f32.mxu0 %v1535_v46  ;;  %1818 = vmatprep.mubr.f32.mxu1 %v1567_v45 }
 0x225   : > { %1723 = vmatmul.mubr.f32.gmra.mxu0 %v1534_v61  ;;  %1819 = vmatmul.mubr.f32.gmra.mxu1 %v1566_v51 }
 0x2a9   : > { %v1634_v42 = vpop.f32.mrf.mxu0  ;;  %v1730_v55 = vpop.f32.mrf.mxu1 }
 0x2aa   : > { %1825 = vst [vmem:[%s3394_s24] sm:$0xff] %v1634_v42  ;;  %1857 = vst [vmem:[%s3394_s24 + $0x100] sm:$0xff] %v1730_v55 }
 0x2ab   : > { %v1636_v44 = vpop.f32.mrf.mxu0  ;;  %v1732_v41 = vpop.f32.mrf.mxu1 }
 0x2ac   : > { %1826 = vst.msk [vmem:[%s3394_s24 + $0x8] sm:$0xff] %vm287_vm0, %v1636_v44  ;;  %1858 = vst.msk [vmem:[%s3394_s24 + $0x108] sm:$0xff] %vm287_vm0, %v1732_v41 }
 0x2ad   : > { %v1640_v8 = vpop.f32.mrf.mxu0  ;;  %v1736_v49 = vpop.f32.mrf.mxu1 }
 0x2ae   : > { %1827 = vst [vmem:[%s3394_s24 + $0x10] sm:$0xff] %v1640_v8  ;;  %1859 = vst [vmem:[%s3394_s24 + $0x110] sm:$0xff] %v1736_v49 }
 0x2af   : > { %v1642_v50 = vpop.f32.mrf.mxu0  ;;  %v1738_v63 = vpop.f32.mrf.mxu1 }
 0x2b0   : > { %1828 = vst.msk [vmem:[%s3394_s24 + $0x18] sm:$0xff] %vm287_vm0, %v1642_v50  ;;  %1860 = vst.msk [vmem:[%s3394_s24 + $0x118] sm:$0xff] %vm287_vm0, %v1738_v63 }
 0x2b1   : > { %v1646_v19 = vpop.f32.mrf.mxu0  ;;  %v1742_v0 = vpop.f32.mrf.mxu1 }
 0x2b2   : > { %1829 = vst [vmem:[%s3394_s24 + $0x20] sm:$0xff] %v1646_v19  ;;  %1861 = vst [vmem:[%s3394_s24 + $0x120] sm:$0xff] %v1742_v0 }
 0x2b3   : > { %v1648_v62 = vpop.f32.mrf.mxu0  ;;  %v1744_v56 = vpop.f32.mrf.mxu1 }
 0x2b4   : > { %1830 = vst.msk [vmem:[%s3394_s24 + $0x28] sm:$0xff] %vm287_vm0, %v1648_v62  ;;  %1862 = vst.msk [vmem:[%s3394_s24 + $0x128] sm:$0xff] %vm287_vm0, %v1744_v56 }
 0x2b5   : > { %v1652_v59 = vpop.f32.mrf.mxu0  ;;  %v1748_v58 = vpop.f32.mrf.mxu1 }
 0x2b6   : > { %1831 = vst [vmem:[%s3394_s24 + $0x30] sm:$0xff] %v1652_v59  ;;  %1863 = vst [vmem:[%s3394_s24 + $0x130] sm:$0xff] %v1748_v58 }
 0x2b7   : > { %v1654_v4 = vpop.f32.mrf.mxu0  ;;  %v1750_v33 = vpop.f32.mrf.mxu1 }
 0x2b8   : > { %1832 = vst.msk [vmem:[%s3394_s24 + $0x38] sm:$0xff] %vm287_vm0, %v1654_v4  ;;  %1864 = vst.msk [vmem:[%s3394_s24 + $0x138] sm:$0xff] %vm287_vm0, %v1750_v33 }
 0x2b9   : > { %v1658_v2 = vpop.f32.mrf.mxu0  ;;  %v1754_v3 = vpop.f32.mrf.mxu1 }
 0x2ba   : > { %1833 = vst [vmem:[%s3394_s24 + $0x40] sm:$0xff] %v1658_v2  ;;  %1865 = vst [vmem:[%s3394_s24 + $0x140] sm:$0xff] %v1754_v3 }
 0x2bb   : > { %v1660_v57 = vpop.f32.mrf.mxu0  ;;  %v1756_v60 = vpop.f32.mrf.mxu1 }
 0x2bc   : > { %1834 = vst.msk [vmem:[%s3394_s24 + $0x48] sm:$0xff] %vm287_vm0, %v1660_v57  ;;  %1866 = vst.msk [vmem:[%s3394_s24 + $0x148] sm:$0xff] %vm287_vm0, %v1756_v60 }
 0x2bd   : > { %v1664_v5 = vpop.f32.mrf.mxu0  ;;  %v1760_v6 = vpop.f32.mrf.mxu1 }
 0x2be   : > { %1835 = vst [vmem:[%s3394_s24 + $0x50] sm:$0xff] %v1664_v5  ;;  %1867 = vst [vmem:[%s3394_s24 + $0x150] sm:$0xff] %v1760_v6 }
 0x2bf   : > { %v1666_v17 = vpop.f32.mrf.mxu0  ;;  %v1762_v7 = vpop.f32.mrf.mxu1 }
 0x2c0   : > { %1836 = vst.msk [vmem:[%s3394_s24 + $0x58] sm:$0xff] %vm287_vm0, %v1666_v17  ;;  %1868 = vst.msk [vmem:[%s3394_s24 + $0x158] sm:$0xff] %vm287_vm0, %v1762_v7 }
 0x2c1   : > { %v1670_v23 = vpop.f32.mrf.mxu0  ;;  %v1766_v22 = vpop.f32.mrf.mxu1 }
 0x2c2   : > { %1837 = vst [vmem:[%s3394_s24 + $0x60] sm:$0xff] %v1670_v23  ;;  %1869 = vst [vmem:[%s3394_s24 + $0x160] sm:$0xff] %v1766_v22 }
 0x2c3   : > { %v1672_v21 = vpop.f32.mrf.mxu0  ;;  %v1768_v16 = vpop.f32.mrf.mxu1 }
 0x2c4   : > { %1838 = vst.msk [vmem:[%s3394_s24 + $0x68] sm:$0xff] %vm287_vm0, %v1672_v21  ;;  %1870 = vst.msk [vmem:[%s3394_s24 + $0x168] sm:$0xff] %vm287_vm0, %v1768_v16 }
 0x2c5   : > { %v1676_v14 = vpop.f32.mrf.mxu0  ;;  %v1772_v12 = vpop.f32.mrf.mxu1 }
 0x2c6   : > { %1839 = vst [vmem:[%s3394_s24 + $0x70] sm:$0xff] %v1676_v14  ;;  %1871 = vst [vmem:[%s3394_s24 + $0x170] sm:$0xff] %v1772_v12 }
 0x2c7   : > { %v1678_v43 = vpop.f32.mrf.mxu0  ;;  %v1774_v9 = vpop.f32.mrf.mxu1 }
 0x2c8   : > { %1840 = vst.msk [vmem:[%s3394_s24 + $0x78] sm:$0xff] %vm287_vm0, %v1678_v43  ;;  %1872 = vst.msk [vmem:[%s3394_s24 + $0x178] sm:$0xff] %vm287_vm0, %v1774_v9 }
 0x2c9   : > { %v1682_v27 = vpop.f32.mrf.mxu0  ;;  %v1778_v25 = vpop.f32.mrf.mxu1 }
 0x2ca   : > { %1841 = vst [vmem:[%s3394_s24 + $0x80] sm:$0xff] %v1682_v27  ;;  %1873 = vst [vmem:[%s3394_s24 + $0x180] sm:$0xff] %v1778_v25 }
 0x2cb   : > { %v1684_v10 = vpop.f32.mrf.mxu0  ;;  %v1780_v15 = vpop.f32.mrf.mxu1 }
 0x2cc   : > { %1842 = vst.msk [vmem:[%s3394_s24 + $0x88] sm:$0xff] %vm287_vm0, %v1684_v10  ;;  %1874 = vst.msk [vmem:[%s3394_s24 + $0x188] sm:$0xff] %vm287_vm0, %v1780_v15 }
 0x2cd   : > { %v1688_v18 = vpop.f32.mrf.mxu0  ;;  %v1784_v31 = vpop.f32.mrf.mxu1 }
 0x2ce   : > { %1843 = vst [vmem:[%s3394_s24 + $0x90] sm:$0xff] %v1688_v18  ;;  %1875 = vst [vmem:[%s3394_s24 + $0x190] sm:$0xff] %v1784_v31 }
 0x2cf   : > { %v1690_v32 = vpop.f32.mrf.mxu0  ;;  %v1786_v52 = vpop.f32.mrf.mxu1 }
 0x2d0   : > { %1844 = vst.msk [vmem:[%s3394_s24 + $0x98] sm:$0xff] %vm287_vm0, %v1690_v32  ;;  %1876 = vst.msk [vmem:[%s3394_s24 + $0x198] sm:$0xff] %vm287_vm0, %v1786_v52 }
 0x2d1   : > { %v1694_v34 = vpop.f32.mrf.mxu0  ;;  %v1790_v28 = vpop.f32.mrf.mxu1 }
 0x2d2   : > { %1845 = vst [vmem:[%s3394_s24 + $0xa0] sm:$0xff] %v1694_v34  ;;  %1877 = vst [vmem:[%s3394_s24 + $0x1a0] sm:$0xff] %v1790_v28 }
 0x2d3   : > { %v1696_v24 = vpop.f32.mrf.mxu0  ;;  %v1792_v30 = vpop.f32.mrf.mxu1 }
 0x2d4   : > { %1846 = vst.msk [vmem:[%s3394_s24 + $0xa8] sm:$0xff] %vm287_vm0, %v1696_v24  ;;  %1878 = vst.msk [vmem:[%s3394_s24 + $0x1a8] sm:$0xff] %vm287_vm0, %v1792_v30 }
 0x2d5   : > { %v1700_v29 = vpop.f32.mrf.mxu0  ;;  %v1796_v1 = vpop.f32.mrf.mxu1 }
 0x2d6   : > { %1847 = vst [vmem:[%s3394_s24 + $0xb0] sm:$0xff] %v1700_v29  ;;  %1879 = vst [vmem:[%s3394_s24 + $0x1b0] sm:$0xff] %v1796_v1 }
 0x2d7   : > { %v1702_v13 = vpop.f32.mrf.mxu0  ;;  %v1798_v48 = vpop.f32.mrf.mxu1 }
 0x2d8   : > { %1848 = vst.msk [vmem:[%s3394_s24 + $0xb8] sm:$0xff] %vm287_vm0, %v1702_v13  ;;  %1880 = vst.msk [vmem:[%s3394_s24 + $0x1b8] sm:$0xff] %vm287_vm0, %v1798_v48 }
 0x2d9   : > { %v1706_v37 = vpop.f32.mrf.mxu0  ;;  %v1802_v38 = vpop.f32.mrf.mxu1 }
 0x2da   : > { %1849 = vst [vmem:[%s3394_s24 + $0xc0] sm:$0xff] %v1706_v37  ;;  %1881 = vst [vmem:[%s3394_s24 + $0x1c0] sm:$0xff] %v1802_v38 }
 0x2db   : > { %v1708_v39 = vpop.f32.mrf.mxu0  ;;  %v1804_v40 = vpop.f32.mrf.mxu1 }
 0x2dc   : > { %1850 = vst.msk [vmem:[%s3394_s24 + $0xc8] sm:$0xff] %vm287_vm0, %v1708_v39  ;;  %1882 = vst.msk [vmem:[%s3394_s24 + $0x1c8] sm:$0xff] %vm287_vm0, %v1804_v40 }
 0x2dd   : > { %v1712_v20 = vpop.f32.mrf.mxu0  ;;  %v1808_v47 = vpop.f32.mrf.mxu1 }
 0x2de   : > { %1851 = vst [vmem:[%s3394_s24 + $0xd0] sm:$0xff] %v1712_v20  ;;  %1883 = vst [vmem:[%s3394_s24 + $0x1d0] sm:$0xff] %v1808_v47 }
 0x2df   : > { %v1714_v11 = vpop.f32.mrf.mxu0  ;;  %v1810_v26 = vpop.f32.mrf.mxu1 }
 0x2e0   : > { %1852 = vst.msk [vmem:[%s3394_s24 + $0xd8] sm:$0xff] %vm287_vm0, %v1714_v11  ;;  %1884 = vst.msk [vmem:[%s3394_s24 + $0x1d8] sm:$0xff] %vm287_vm0, %v1810_v26 }
 0x2e1   : > { %v1718_v54 = vpop.f32.mrf.mxu0  ;;  %v1814_v35 = vpop.f32.mrf.mxu1 }
 0x2e2   : > { %1853 = vst [vmem:[%s3394_s24 + $0xe0] sm:$0xff] %v1718_v54  ;;  %1885 = vst [vmem:[%s3394_s24 + $0x1e0] sm:$0xff] %v1814_v35 }
 0x2e3   : > { %v1720_v36 = vpop.f32.mrf.mxu0  ;;  %v1816_v53 = vpop.f32.mrf.mxu1 }
 0x2e4   : > { %1854 = vst.msk [vmem:[%s3394_s24 + $0xe8] sm:$0xff] %vm287_vm0, %v1720_v36  ;;  %1886 = vst.msk [vmem:[%s3394_s24 + $0x1e8] sm:$0xff] %vm287_vm0, %v1816_v53 }
 0x2e5   : > { %v1724_v46 = vpop.f32.mrf.mxu0  ;;  %v1820_v45 = vpop.f32.mrf.mxu1 }
 0x2e6   : > { %1855 = vst [vmem:[%s3394_s24 + $0xf0] sm:$0xff] %v1724_v46  ;;  %1887 = vst [vmem:[%s3394_s24 + $0x1f0] sm:$0xff] %v1820_v45 }
 0x2e7   : > { %v1726_v61 = vpop.f32.mrf.mxu0  ;;  %v1822_v51 = vpop.f32.mrf.mxu1 }
 0x2e8   : > { %1856 = vst.msk [vmem:[%s3394_s24 + $0xf8] sm:$0xff] %vm287_vm0, %v1726_v61  ;;  %1888 = vst.msk [vmem:[%s3394_s24 + $0x1f8] sm:$0xff] %vm287_vm0, %v1822_v51 }
 0x2e9 PF: > { %p14_p9 = scmp.ge.s32.totalorder %s2325_s20, 6   ;;  %s3515_s15 = smov %s2266_s16 }
 0x2ea   : > { %s3516_s16 = smov %s2270_s17  ;;  %s3517_s17 = smov %s2335_s23 }
 0x2eb   : > { %s3518_s18 = smov %s2325_s20  ;;  %16 = sbr.rel (!%p14_p9) target bundleno = 3 (0x3), region = 76 }
 0x2f0   :  { %1913 = vsyncpa [#allocation3], 1 }
 0x2f1   :  { %1915 = vsyncpa [#allocation3 + $0x1], 1 }

</bundles_post_ra>
